<compile_context>
chip_gen: v6e
topology: v6e:2x2x1
jax: 0.10.0
libtpu: 0.0.40
codegen_flags: <defaults>
</compile_context>

<pallas_src>
import functools

import jax
import jax.numpy as jnp
from jax.experimental import pallas as pl
from jax.experimental.pallas import tpu as pltpu


def _round_up(x, m):
    return ((x + m - 1) // m) * m


# ---------------------------------------------------------------------------
# Fused kernel: in-kernel im2col + 3x3 conv + bias + ReLU + channel concat
# ---------------------------------------------------------------------------
def _rdb_conv_kernel(xm_ref, xh0_ref, xh1_ref, w_ref, b_ref, o_ref,
                     *, th, W, Cin, G):
    """One (batch, row-block) step.

    xm_ref : (1, th, W+2, Cin)  padded input rows [i*th, i*th+th)
    xh0_ref: (1, 1,  W+2, Cin)  padded input row   i*th+th      (halo)
    xh1_ref: (1, 1,  W+2, Cin)  padded input row   i*th+th+1    (halo)
    w_ref  : (9, Cin, G)        per-tap weights, tap = ky*3 + kx
    b_ref  : (1, G) f32         bias
    o_ref  : (1, th*W, Cin+G)   [ x passthrough | relu(conv) ]
    """
    # Assemble the halo'd slab in VMEM: (th+2, W+2, Cin).
    slab = jnp.concatenate([xm_ref[0], xh0_ref[0], xh1_ref[0]], axis=0)

    cdt = w_ref.dtype
    acc = jnp.zeros((th * W, G), jnp.float32)
    for ky in range(3):                      # 9 taps, unrolled at trace time
        for kx in range(3):
            tap = slab[ky:ky + th, kx:kx + W, :].reshape(th * W, Cin)
            acc = acc + jnp.dot(tap.astype(cdt), w_ref[ky * 3 + kx],
                                preferred_element_type=jnp.float32)
    conv = jnp.maximum(acc + b_ref[...], 0.0)                     # (th*W, G) f32

    # Exact passthrough of x (interior of the slab), fused concat, one store.
    x_pass = slab[1:1 + th, 1:1 + W, :].reshape(th * W, Cin)
    o_ref[0] = jnp.concatenate([x_pass, conv.astype(o_ref.dtype)], axis=-1)


# ---------------------------------------------------------------------------
# Tiling / VMEM heuristics
# ---------------------------------------------------------------------------
def _pick_rows_per_block(N, H, W):
    """Output rows handled per grid step (a divisor of H).

    Prefers large pixel tiles (better DMA efficiency, less per-step overhead),
    capped at ~1024 pixel rows, while keeping >=2 total grid blocks when
    possible so both v7x TensorCores get work; th*W stays a sublane multiple.
    """
    divisors = sorted((d for d in range(1, H + 1) if H % d == 0), reverse=True)
    cands = [d for d in divisors if d == H or (d * W) % 8 == 0]
    good = [d for d in cands if d * W <= 1024] or [cands[-1]]
    th = good[0]
    if N * (H // th) < 2:            # give the second TensorCore something to do
        for d in good:
            if N * (H // d) >= 2:
                th = d
                break
    return th


def _vmem_limit_bytes(th, W, Cin, G, x_itemsize, w_itemsize):
    """Scoped-VMEM request from the actual (lane/sublane padded) footprint,
    capped at 48 MiB to leave headroom on v7x (64 MiB physical per TC)."""
    lane = lambda c: _round_up(c, 128)
    sub = lambda r: _round_up(max(r, 1), 8)
    Wp2 = W + 2
    x_blk = th * sub(Wp2) * lane(Cin) * x_itemsize            # main input block
    halo = 2 * sub(Wp2) * lane(Cin) * x_itemsize              # two 1-row halos
    o_blk = sub(th * W) * lane(Cin + G) * x_itemsize          # fused output block
    w_blk = 9 * sub(Cin) * lane(G) * w_itemsize
    b_blk = 8 * lane(G) * 4
    slab = (th + 2) * sub(Wp2) * lane(Cin) * x_itemsize       # in-kernel slab value
    acc = sub(th * W) * lane(G) * 4                           # f32 accumulator
    tap = sub(th * W) * lane(Cin) * max(x_itemsize, w_itemsize)
    need = 2 * (x_blk + halo + o_blk + w_blk + b_blk) + slab + 2 * acc + 2 * tap
    need += 4 << 20                                           # compiler scratch headroom
    return int(min(max(need, 16 << 20), 48 << 20))


# ---------------------------------------------------------------------------
# One-time weight preparation (hoisted out of the forward pass)
# ---------------------------------------------------------------------------
def prepare_rdb_conv_params(w, b, compute_dtype=None):
    """w: (G, Cin, 3, 3) PyTorch OIHW layout, b: (G,).

    Returns per-tap weights (9, Cin, G) with tap = ky*3+kx, and bias (1, G) f32.
    compute_dtype=None keeps w.dtype (exact f32 path); pass jnp.bfloat16 to run
    the MXU taps in bf16 (activations are cast in VMEM, no extra HBM traffic;
    the x passthrough of the concat stays bit-exact either way).
    """
    G, Cin, kh, kw = w.shape
    assert (kh, kw) == (3, 3), "kernel is specialized to the module default kSize=3"
    dt = w.dtype if compute_dtype is None else compute_dtype
    w_taps = jnp.transpose(w, (2, 3, 1, 0)).reshape(kh * kw, Cin, G).astype(dt)
    b_row = b.reshape(1, G).astype(jnp.float32)
    return w_taps, b_row


# ---------------------------------------------------------------------------
# Forward passes
# ---------------------------------------------------------------------------
@jax.jit
def rdb_conv_forward_nhwc(x_nhwc, w_taps, b_row):
    """NHWC core: returns (N, H, W, Cin+G) = cat([x, relu(conv3x3(x))], -1).
    Use this directly when chaining RDB layers to keep activations NHWC."""
    N, H, W, Cin = x_nhwc.shape
    G = w_taps.shape[-1]
    Wp2 = W + 2

    th = _pick_rows_per_block(N, H, W)
    R = H // th

    x_pad = jnp.pad(x_nhwc, ((0, 0), (1, 1), (1, 1), (0, 0)))   # (N, H+2, W+2, Cin)

    kernel = functools.partial(_rdb_conv_kernel, th=th, W=W, Cin=Cin, G=G)
    vmem_limit = _vmem_limit_bytes(
        th, W, Cin, G, x_nhwc.dtype.itemsize, w_taps.dtype.itemsize)

    out_flat = pl.pallas_call(
        kernel,
        out_shape=jax.ShapeDtypeStruct((N, H * W, Cin + G), x_nhwc.dtype),
        grid_spec=pltpu.PrefetchScalarGridSpec(
            num_scalar_prefetch=0,
            grid=(N, R),
            in_specs=[
                # Row block of the padded input + two single-row halos: three
                # BlockSpec views of the SAME array -> in-kernel im2col, no
                # HBM patch tensor, fully auto-pipelined, no cross-step state.
                pl.BlockSpec((1, th, Wp2, Cin), lambda n, i: (n, i, 0, 0)),
                pl.BlockSpec((1, 1, Wp2, Cin), lambda n, i: (n, i * th + th, 0, 0)),
                pl.BlockSpec((1, 1, Wp2, Cin), lambda n, i: (n, i * th + th + 1, 0, 0)),
                # Weights / bias: tiny, same block every step -> stay resident.
                pl.BlockSpec((9, Cin, G), lambda n, i: (0, 0, 0)),
                pl.BlockSpec((1, G), lambda n, i: (0, 0)),
            ],
            out_specs=pl.BlockSpec((1, th * W, Cin + G), lambda n, i: (n, i, 0)),
        ),
        compiler_params=pltpu.CompilerParams(
            dimension_semantics=("parallel", "parallel"),
            vmem_limit_bytes=vmem_limit,
        ),
    )(x_pad, x_pad, x_pad, w_taps, b_row)

    return out_flat.reshape(N, H, W, Cin + G)


@jax.jit
def rdb_conv_forward(x_nchw, w_taps, b_row):
    """NCHW wrapper matching the PyTorch module interface.
    For chained RDB layers prefer rdb_conv_forward_nhwc (transpose once)."""
    x_nhwc = jnp.transpose(x_nchw, (0, 2, 3, 1))
    out_nhwc = rdb_conv_forward_nhwc(x_nhwc, w_taps, b_row)
    return jnp.transpose(out_nhwc, (0, 3, 1, 2))


if __name__ == "__main__":
    key = jax.random.PRNGKey(0)
    k_x, k_w, k_b = jax.random.split(key, 3)

    # RDB_Conv(inChannels=4, growRate=32) at a small spatial size.
    N, Cin, H, W = 2, 4, 16, 16
    G = 32

    x = jax.random.normal(k_x, (N, Cin, H, W), jnp.float32)
    w = jax.random.normal(k_w, (G, Cin, 3, 3), jnp.float32) * (2.0 / (Cin * 9)) ** 0.5
    b = jax.random.normal(k_b, (G,), jnp.float32) * 0.01

    w_taps, b_row = prepare_rdb_conv_params(w, b)      # one-time weight prep (f32)
    out = rdb_conv_forward(x, w_taps, b_row)
    out = jax.block_until_ready(out)

    assert out.shape == (N, Cin + G, H, W), out.shape
    assert bool(jnp.all(jnp.isfinite(out)))

    # The x passthrough of the concat must be bit-exact.
    assert bool(jnp.array_equal(out[:, :Cin], x))

    # Pure-JAX reference.
    ref_conv = jax.lax.conv_general_dilated(
        x, w, window_strides=(1, 1), padding=((1, 1), (1, 1)),
        dimension_numbers=("NCHW", "OIHW", "NCHW"),
        precision=jax.lax.Precision.HIGHEST)
    ref = jnp.concatenate(
        [x, jnp.maximum(ref_conv + b[None, :, None, None], 0.0)], axis=1)
    err = float(jnp.max(jnp.abs(out - ref)))
    assert err < 3e-2, err

    print("KERNEL_OK")
</pallas_src>

<mosaic_0001>
module attributes {stable_mosaic.version = 11 : i64} {
  func.func @_rdb_conv_kernel(%arg0: i32, %arg1: i32, %arg2: memref<1x16x18x4xf32, #tpu.memory_space<vmem>>, %arg3: memref<1x1x18x4xf32, #tpu.memory_space<vmem>>, %arg4: memref<1x1x18x4xf32, #tpu.memory_space<vmem>>, %arg5: memref<9x4x32xf32, #tpu.memory_space<vmem>>, %arg6: memref<1x32xf32, #tpu.memory_space<vmem>>, %arg7: memref<1x256x36xf32, #tpu.memory_space<vmem>>) attributes {dimension_semantics = [#tpu.dimension_semantics<parallel>, #tpu.dimension_semantics<parallel>], iteration_bounds = array<i64: 2, 1>, scalar_prefetch = 0 : i64, scratch_operands = 0 : i64, tpu.core_type = #tpu.core_type<tc>, window_params = [{transform_indices = @transform_0, window_bounds = array<i64: 1, 16, 18, 4>}, {transform_indices = @transform_1, window_bounds = array<i64: 1, 1, 18, 4>}, {transform_indices = @transform_2, window_bounds = array<i64: 1, 1, 18, 4>}, {pipeline_mode = #tpu.pipeline_mode<synchronous>, transform_indices = @transform_3, window_bounds = array<i64: 9, 4, 32>}, {pipeline_mode = #tpu.pipeline_mode<synchronous>, transform_indices = @transform_4, window_bounds = array<i64: 1, 32>}, {transform_indices = @transform_5, window_bounds = array<i64: 1, 256, 36>}]} {
    %c0 = arith.constant 0 : index
    %c0_0 = arith.constant 0 : index
    %c0_1 = arith.constant 0 : index
    %c0_2 = arith.constant 0 : index
    %0 = vector.load %arg2[%c0, %c0_0, %c0_1, %c0_2] : memref<1x16x18x4xf32, #tpu.memory_space<vmem>>, vector<1x16x18x4xf32>
    %1 = vector.shape_cast %0 : vector<1x16x18x4xf32> to vector<16x18x4xf32>
    %c0_3 = arith.constant 0 : index
    %c0_4 = arith.constant 0 : index
    %c0_5 = arith.constant 0 : index
    %c0_6 = arith.constant 0 : index
    %2 = vector.load %arg3[%c0_3, %c0_4, %c0_5, %c0_6] : memref<1x1x18x4xf32, #tpu.memory_space<vmem>>, vector<1x1x18x4xf32>
    %3 = vector.shape_cast %2 : vector<1x1x18x4xf32> to vector<1x18x4xf32>
    %c0_7 = arith.constant 0 : index
    %c0_8 = arith.constant 0 : index
    %c0_9 = arith.constant 0 : index
    %c0_10 = arith.constant 0 : index
    %4 = vector.load %arg4[%c0_7, %c0_8, %c0_9, %c0_10] : memref<1x1x18x4xf32, #tpu.memory_space<vmem>>, vector<1x1x18x4xf32>
    %5 = vector.shape_cast %4 : vector<1x1x18x4xf32> to vector<1x18x4xf32>
    %6 = tpu.concatenate %1, %3, %5 in 0 : vector<16x18x4xf32>, vector<1x18x4xf32>, vector<1x18x4xf32> -> vector<18x18x4xf32>
    %cst = arith.constant 0.000000e+00 : f32
    %7 = vector.broadcast %cst : f32 to vector<256x32xf32>
    %8 = vector.extract_strided_slice %6 {offsets = [0, 0, 0], sizes = [16, 16, 4], strides = [1, 1, 1]} : vector<18x18x4xf32> to vector<16x16x4xf32>
    %9 = vector.shape_cast %8 : vector<16x16x4xf32> to vector<256x4xf32>
    %c0_11 = arith.constant 0 : index
    %c0_12 = arith.constant 0 : index
    %c0_13 = arith.constant 0 : index
    %10 = vector.load %arg5[%c0_11, %c0_12, %c0_13] : memref<9x4x32xf32, #tpu.memory_space<vmem>>, vector<1x4x32xf32>
    %11 = vector.shape_cast %10 : vector<1x4x32xf32> to vector<4x32xf32>
    %cst_14 = arith.constant dense<0.000000e+00> : vector<256x32xf32>
    %12 = tpu.matmul %9, %11, %cst_14 {dimension_numbers = #tpu.dot_dimension_numbers<[1], [0], [0], [1], [0, 0, 1, 1], [], []>} : vector<256x4xf32>, vector<4x32xf32>, vector<256x32xf32> -> vector<256x32xf32>
    %13 = arith.addf %7, %12 : vector<256x32xf32>
    %14 = vector.extract_strided_slice %6 {offsets = [0, 1, 0], sizes = [16, 16, 4], strides = [1, 1, 1]} : vector<18x18x4xf32> to vector<16x16x4xf32>
    %15 = vector.shape_cast %14 : vector<16x16x4xf32> to vector<256x4xf32>
    %c1 = arith.constant 1 : index
    %c0_15 = arith.constant 0 : index
    %c0_16 = arith.constant 0 : index
    %16 = vector.load %arg5[%c1, %c0_15, %c0_16] : memref<9x4x32xf32, #tpu.memory_space<vmem>>, vector<1x4x32xf32>
    %17 = vector.shape_cast %16 : vector<1x4x32xf32> to vector<4x32xf32>
    %cst_17 = arith.constant dense<0.000000e+00> : vector<256x32xf32>
    %18 = tpu.matmul %15, %17, %cst_17 {dimension_numbers = #tpu.dot_dimension_numbers<[1], [0], [0], [1], [0, 0, 1, 1], [], []>} : vector<256x4xf32>, vector<4x32xf32>, vector<256x32xf32> -> vector<256x32xf32>
    %19 = arith.addf %13, %18 : vector<256x32xf32>
    %20 = vector.extract_strided_slice %6 {offsets = [0, 2, 0], sizes = [16, 16, 4], strides = [1, 1, 1]} : vector<18x18x4xf32> to vector<16x16x4xf32>
    %21 = vector.shape_cast %20 : vector<16x16x4xf32> to vector<256x4xf32>
    %c2 = arith.constant 2 : index
    %c0_18 = arith.constant 0 : index
    %c0_19 = arith.constant 0 : index
    %22 = vector.load %arg5[%c2, %c0_18, %c0_19] : memref<9x4x32xf32, #tpu.memory_space<vmem>>, vector<1x4x32xf32>
    %23 = vector.shape_cast %22 : vector<1x4x32xf32> to vector<4x32xf32>
    %cst_20 = arith.constant dense<0.000000e+00> : vector<256x32xf32>
    %24 = tpu.matmul %21, %23, %cst_20 {dimension_numbers = #tpu.dot_dimension_numbers<[1], [0], [0], [1], [0, 0, 1, 1], [], []>} : vector<256x4xf32>, vector<4x32xf32>, vector<256x32xf32> -> vector<256x32xf32>
    %25 = arith.addf %19, %24 : vector<256x32xf32>
    %26 = vector.extract_strided_slice %6 {offsets = [1, 0, 0], sizes = [16, 16, 4], strides = [1, 1, 1]} : vector<18x18x4xf32> to vector<16x16x4xf32>
    %27 = vector.shape_cast %26 : vector<16x16x4xf32> to vector<256x4xf32>
    %c3 = arith.constant 3 : index
    %c0_21 = arith.constant 0 : index
    %c0_22 = arith.constant 0 : index
    %28 = vector.load %arg5[%c3, %c0_21, %c0_22] : memref<9x4x32xf32, #tpu.memory_space<vmem>>, vector<1x4x32xf32>
    %29 = vector.shape_cast %28 : vector<1x4x32xf32> to vector<4x32xf32>
    %cst_23 = arith.constant dense<0.000000e+00> : vector<256x32xf32>
    %30 = tpu.matmul %27, %29, %cst_23 {dimension_numbers = #tpu.dot_dimension_numbers<[1], [0], [0], [1], [0, 0, 1, 1], [], []>} : vector<256x4xf32>, vector<4x32xf32>, vector<256x32xf32> -> vector<256x32xf32>
    %31 = arith.addf %25, %30 : vector<256x32xf32>
    %32 = vector.extract_strided_slice %6 {offsets = [1, 1, 0], sizes = [16, 16, 4], strides = [1, 1, 1]} : vector<18x18x4xf32> to vector<16x16x4xf32>
    %33 = vector.shape_cast %32 : vector<16x16x4xf32> to vector<256x4xf32>
    %c4 = arith.constant 4 : index
    %c0_24 = arith.constant 0 : index
    %c0_25 = arith.constant 0 : index
    %34 = vector.load %arg5[%c4, %c0_24, %c0_25] : memref<9x4x32xf32, #tpu.memory_space<vmem>>, vector<1x4x32xf32>
    %35 = vector.shape_cast %34 : vector<1x4x32xf32> to vector<4x32xf32>
    %cst_26 = arith.constant dense<0.000000e+00> : vector<256x32xf32>
    %36 = tpu.matmul %33, %35, %cst_26 {dimension_numbers = #tpu.dot_dimension_numbers<[1], [0], [0], [1], [0, 0, 1, 1], [], []>} : vector<256x4xf32>, vector<4x32xf32>, vector<256x32xf32> -> vector<256x32xf32>
    %37 = arith.addf %31, %36 : vector<256x32xf32>
    %38 = vector.extract_strided_slice %6 {offsets = [1, 2, 0], sizes = [16, 16, 4], strides = [1, 1, 1]} : vector<18x18x4xf32> to vector<16x16x4xf32>
    %39 = vector.shape_cast %38 : vector<16x16x4xf32> to vector<256x4xf32>
    %c5 = arith.constant 5 : index
    %c0_27 = arith.constant 0 : index
    %c0_28 = arith.constant 0 : index
    %40 = vector.load %arg5[%c5, %c0_27, %c0_28] : memref<9x4x32xf32, #tpu.memory_space<vmem>>, vector<1x4x32xf32>
    %41 = vector.shape_cast %40 : vector<1x4x32xf32> to vector<4x32xf32>
    %cst_29 = arith.constant dense<0.000000e+00> : vector<256x32xf32>
    %42 = tpu.matmul %39, %41, %cst_29 {dimension_numbers = #tpu.dot_dimension_numbers<[1], [0], [0], [1], [0, 0, 1, 1], [], []>} : vector<256x4xf32>, vector<4x32xf32>, vector<256x32xf32> -> vector<256x32xf32>
    %43 = arith.addf %37, %42 : vector<256x32xf32>
    %44 = vector.extract_strided_slice %6 {offsets = [2, 0, 0], sizes = [16, 16, 4], strides = [1, 1, 1]} : vector<18x18x4xf32> to vector<16x16x4xf32>
    %45 = vector.shape_cast %44 : vector<16x16x4xf32> to vector<256x4xf32>
    %c6 = arith.constant 6 : index
    %c0_30 = arith.constant 0 : index
    %c0_31 = arith.constant 0 : index
    %46 = vector.load %arg5[%c6, %c0_30, %c0_31] : memref<9x4x32xf32, #tpu.memory_space<vmem>>, vector<1x4x32xf32>
    %47 = vector.shape_cast %46 : vector<1x4x32xf32> to vector<4x32xf32>
    %cst_32 = arith.constant dense<0.000000e+00> : vector<256x32xf32>
    %48 = tpu.matmul %45, %47, %cst_32 {dimension_numbers = #tpu.dot_dimension_numbers<[1], [0], [0], [1], [0, 0, 1, 1], [], []>} : vector<256x4xf32>, vector<4x32xf32>, vector<256x32xf32> -> vector<256x32xf32>
    %49 = arith.addf %43, %48 : vector<256x32xf32>
    %50 = vector.extract_strided_slice %6 {offsets = [2, 1, 0], sizes = [16, 16, 4], strides = [1, 1, 1]} : vector<18x18x4xf32> to vector<16x16x4xf32>
    %51 = vector.shape_cast %50 : vector<16x16x4xf32> to vector<256x4xf32>
    %c7 = arith.constant 7 : index
    %c0_33 = arith.constant 0 : index
    %c0_34 = arith.constant 0 : index
    %52 = vector.load %arg5[%c7, %c0_33, %c0_34] : memref<9x4x32xf32, #tpu.memory_space<vmem>>, vector<1x4x32xf32>
    %53 = vector.shape_cast %52 : vector<1x4x32xf32> to vector<4x32xf32>
    %cst_35 = arith.constant dense<0.000000e+00> : vector<256x32xf32>
    %54 = tpu.matmul %51, %53, %cst_35 {dimension_numbers = #tpu.dot_dimension_numbers<[1], [0], [0], [1], [0, 0, 1, 1], [], []>} : vector<256x4xf32>, vector<4x32xf32>, vector<256x32xf32> -> vector<256x32xf32>
    %55 = arith.addf %49, %54 : vector<256x32xf32>
    %56 = vector.extract_strided_slice %6 {offsets = [2, 2, 0], sizes = [16, 16, 4], strides = [1, 1, 1]} : vector<18x18x4xf32> to vector<16x16x4xf32>
    %57 = vector.shape_cast %56 : vector<16x16x4xf32> to vector<256x4xf32>
    %c8 = arith.constant 8 : index
    %c0_36 = arith.constant 0 : index
    %c0_37 = arith.constant 0 : index
    %58 = vector.load %arg5[%c8, %c0_36, %c0_37] : memref<9x4x32xf32, #tpu.memory_space<vmem>>, vector<1x4x32xf32>
    %59 = vector.shape_cast %58 : vector<1x4x32xf32> to vector<4x32xf32>
    %cst_38 = arith.constant dense<0.000000e+00> : vector<256x32xf32>
    %60 = tpu.matmul %57, %59, %cst_38 {dimension_numbers = #tpu.dot_dimension_numbers<[1], [0], [0], [1], [0, 0, 1, 1], [], []>} : vector<256x4xf32>, vector<4x32xf32>, vector<256x32xf32> -> vector<256x32xf32>
    %61 = arith.addf %55, %60 : vector<256x32xf32>
    %c0_39 = arith.constant 0 : index
    %c0_40 = arith.constant 0 : index
    %62 = vector.load %arg6[%c0_39, %c0_40] : memref<1x32xf32, #tpu.memory_space<vmem>>, vector<1x32xf32>
    %63 = vector.broadcast %62 : vector<1x32xf32> to vector<256x32xf32>
    %64 = arith.addf %61, %63 : vector<256x32xf32>
    %cst_41 = arith.constant 0.000000e+00 : f32
    %65 = vector.broadcast %cst_41 : f32 to vector<256x32xf32>
    %66 = arith.maximumf %64, %65 : vector<256x32xf32>
    %67 = vector.extract_strided_slice %6 {offsets = [1, 1, 0], sizes = [16, 16, 4], strides = [1, 1, 1]} : vector<18x18x4xf32> to vector<16x16x4xf32>
    %68 = vector.shape_cast %67 : vector<16x16x4xf32> to vector<256x4xf32>
    %69 = tpu.concatenate %68, %66 in 1 : vector<256x4xf32>, vector<256x32xf32> -> vector<256x36xf32>
    %c0_42 = arith.constant 0 : index
    %c0_43 = arith.constant 0 : index
    %c0_44 = arith.constant 0 : index
    %70 = vector.load %arg7[%c0_42, %c0_43, %c0_44] : memref<1x256x36xf32, #tpu.memory_space<vmem>>, vector<1x256x36xf32>
    %71 = vector.shape_cast %70 : vector<1x256x36xf32> to vector<256x36xf32>
    %72 = vector.shape_cast %69 : vector<256x36xf32> to vector<1x256x36xf32>
    tpu.vector_store %arg7[%c0_42, %c0_43, %c0_44], %72 {strides = array<i32>} : memref<1x256x36xf32, #tpu.memory_space<vmem>>, vector<1x256x36xf32>,
    return
  }
  func.func @transform_0(%arg0: i32, %arg1: i32) -> (i32, i32, i32, i32) {
    %c0_i32 = arith.constant 0 : i32
    %c0_i32_0 = arith.constant 0 : i32
    %c0_i32_1 = arith.constant 0 : i32
    return %arg0, %arg1, %c0_i32, %c0_i32_0 : i32, i32, i32, i32
  }
  func.func @transform_1(%arg0: i32, %arg1: i32) -> (i32, i32, i32, i32) {
    %c16_i32 = arith.constant 16 : i32
    %0 = arith.muli %arg1, %c16_i32 : i32
    %c16_i32_0 = arith.constant 16 : i32
    %1 = arith.addi %0, %c16_i32_0 : i32
    %c0_i32 = arith.constant 0 : i32
    %c0_i32_1 = arith.constant 0 : i32
    %c0_i32_2 = arith.constant 0 : i32
    return %arg0, %1, %c0_i32, %c0_i32_1 : i32, i32, i32, i32
  }
  func.func @transform_2(%arg0: i32, %arg1: i32) -> (i32, i32, i32, i32) {
    %c16_i32 = arith.constant 16 : i32
    %0 = arith.muli %arg1, %c16_i32 : i32
    %c16_i32_0 = arith.constant 16 : i32
    %1 = arith.addi %0, %c16_i32_0 : i32
    %c1_i32 = arith.constant 1 : i32
    %2 = arith.addi %1, %c1_i32 : i32
    %c0_i32 = arith.constant 0 : i32
    %c0_i32_1 = arith.constant 0 : i32
    %c0_i32_2 = arith.constant 0 : i32
    return %arg0, %2, %c0_i32, %c0_i32_1 : i32, i32, i32, i32
  }
  func.func @transform_3(%arg0: i32, %arg1: i32) -> (i32, i32, i32) {
    %c0_i32 = arith.constant 0 : i32
    %c0_i32_0 = arith.constant 0 : i32
    %c0_i32_1 = arith.constant 0 : i32
    %c0_i32_2 = arith.constant 0 : i32
    return %c0_i32, %c0_i32_0, %c0_i32_1 : i32, i32, i32
  }
  func.func @transform_4(%arg0: i32, %arg1: i32) -> (i32, i32) {
    %c0_i32 = arith.constant 0 : i32
    %c0_i32_0 = arith.constant 0 : i32
    %c0_i32_1 = arith.constant 0 : i32
    return %c0_i32, %c0_i32_0 : i32, i32
  }
  func.func @transform_5(%arg0: i32, %arg1: i32) -> (i32, i32, i32) {
    %c0_i32 = arith.constant 0 : i32
    %c0_i32_0 = arith.constant 0 : i32
    return %arg0, %arg1, %c0_i32 : i32, i32, i32
  }
}

</mosaic_0001>

<bundles_post_ra>
// kernel: rdb_conv_forward_nhwc.1
= control target key start
LH: loop header
LB: loop body
LE: loop exit
PB: predicated region body
PF: predicated region fallthrough
CT: control target
= control target key end

     0   :  { %10 = vsyncpa [#allocation3], 0  ;;  %s6735_s0 = inlined_call_operand.vmem [shape: f32[2,18,18,4], index: 0, kind: input, shape index: {}, may-alias: {0,1,2}]   ;;  %s6736_s1 = inlined_call_operand.vmem [shape: f32[2,18,18,4], index: 1, kind: input, shape index: {}, may-alias: {0,1,2}]   ;;  %s6737_s2 = inlined_call_operand.vmem [shape: f32[2,18,18,4], index: 2, kind: input, shape index: {}, may-alias: {0,1,2}]   ;;  %s6738_s3 = inlined_call_operand.vmem [shape: f32[9,4,32], index: 3, kind: input, shape index: {}]   ;;  %s6739_s4 = inlined_call_operand.vmem [shape: f32[1,32], index: 4, kind: input, shape index: {}]   ;;  %s6740_s5 = inlined_call_operand.hbm [shape: f32[2,256,36], index: 5, kind: output, shape index: {}]  }
   0x1   :  { %12 = vsyncpa [#allocation3 + $0x1], 0  ;;  %s4862_s18 = smov 0   ;;  %s4864_s19 = smov 0  }
   0x2   :  { %s4866_s20 = smov 0   ;;  %s4868_s21 = smov 0  }
   0x3   :  { %s4870_s22 = smov 0   ;;  %s4872_s23 = smov 0  }
   0x4 LB: > { %s3615_s24 = sadd.s32 4294967295, %s4826_s23   ;;  %s3616_s25 = sadd.s32 4294967294, %s4826_s23   ;;  %s4826_s23 = sphi %s4872_s23, %s18_s23   ;;  %s4822_s22 = sphi %s4870_s22, %s7039_s22   ;;  %s4818_s21 = sphi %s4868_s21, %s7038_s21   ;;  %s4814_s20 = sphi %s4866_s20, %s7037_s20   ;;  %s4810_s19 = sphi %s4864_s19, %s7036_s19   ;;  %s4806_s18 = sphi %s4862_s18, %s7035_s18  }
   0x5   : > { %s30_s26 = sadd.s32 1, %s4822_s22  ;;  %s173_s27 = sadd.s32 1, %s4814_s20 }
   0x6   : > { %p32_p0 = scmp.ge.s32.totalorder %s30_s26, 2  ;;  %p183_p1 = scmp.ne.s32.totalorder %s4814_s20, %s4810_s19 }
   0x7   : > { %p184_p2 = scmp.eq.s32.totalorder %s3615_s24, 1  ;;  %p189_p3 = scmp.ne.s32.totalorder %s4810_s19, %s4806_s18 }
   0x8   : > { %s7041_s26 = smov (%p32_p0, %s30_s26), 0  ;;  %p190_p5 = scmp.eq.s32.totalorder %s3616_s25, 1 }
   0x9   : > { %p4902_p4 = por %p184_p2, %p183_p1  ;;  %s168_s29 = ssub.s32 %s4822_s22, %s7041_s26 }
   0xa   : > { %p3619_p6 = scmp.ge.s32.totalorder %s4826_s23, 1  ;;  %p171_p7 = scmp.eq.s32.totalorder %s168_s29, 0 }
   0xb   : > { %p4909_p8 = por %p190_p5, %p189_p3  ;;  %p270_p9 = scmp.lt.s32.totalorder %s4826_s23, 3 }
   0xc   : > { %s4915_s6 = scalar_select %p171_p7, %s4814_s20, %s173_s27  }
   0xd   : > { %p271_p10 = pnand %p3619_p6, %p270_p9 }
   0xf   : > { %274 = sbr.rel (%p271_p10) target bundleno = 652 (0x28c), region = 40 }
  0x14   : > { %v3624_v0 = vld [vmem:[%s6738_s3 + $0x4] sm:$0xf]  ;;  %vm629_vm0 = vcmask 1043456   ;;  %p336_p11 = scmp.lt.s32.totalorder %s4818_s21, 1  ;;  %v432_v1 = vld [vmem:[%s6738_s3] sm:$0xf] }
  0x15   : > { %4687 = vmatprep.subr.msk.mxu1 %vm629_vm0, %v3624_v0  ;;  %4237 = vmatprep.subr.msk.mxu0 %vm629_vm0, %v3624_v0  ;;  %v3691_v2 = vld [vmem:[%s6738_s3 + $0x8] sm:$0xf]  ;;  %vm481_vm1 = vcmask 1046528   ;;  %vm564_vm2 = vcmask 31744   ;;  %v4983_v21 = vld [vmem:[%s6738_s3 + $0xc] sm:$0xf] }
  0x16   : > { %4688 = vmatpush3.msk.msra.mxu1 %vm629_vm0, %v3624_v0  ;;  %4238 = vmatpush3.msk.msra.mxu0 %vm629_vm0, %v3624_v0  ;;  %s337_s13 = scalar_select %p336_p11, %s4818_s21, 1  ;;  %v5001_v28 = vld [vmem:[%s6738_s3 + $0x10] sm:$0xf]  ;;  %vm1150_vm3 = vcmask 1045504   ;;  %vm3442_vm4 = vcmask 293888  }
  0x17   : > { %4287 = vmatprep.subr.msk.mxu1 %vm629_vm0, %v432_v1  ;;  %4337 = vmatprep.subr.msk.mxu0 %vm629_vm0, %v3691_v2  ;;  %s4828_s10 = smov 4   ;;  %s327_s11 = sand.u32 1, %s4810_s19  }
  0x18   : > { %s4934_s14 = smul.u32 432, %s337_s13  ;;  %s3620_s12 = sshll.u32 %s327_s11, 8 }
  0x19   : > { %s6551_s13 = scalar_lea.vmem [#allocation2], %s3620_s12  ;;  %s3939_s15 = sshll.u32 %s4818_s21, 12 }
  0x1a   : > { %s4940_s17 = scalar_lea.vmem %s6735_s0, %s4934_s14  ;;  %s3936_s16 = sadd.s32 384, %s4934_s14 }
  0x1b   : > { %v4943_v3 = vld [vmem:[%s4940_s17] sm:$0xff]  ;;  %v4946_v4 = vld [vmem:[%s4940_s17 + $0x8] sm:$0xff]  ;;  %v4958_v10 = vld [vmem:[%s4940_s17 + $0x10] sm:$0x3]  ;;  %s361_s25 = scalar_lea.vmem %s6736_s1, %s3936_s16  ;;  %s3938_s27 = sadd.s32 408, %s4934_s14 }
  0x1c   : > { %v4949_v5 = vld [vmem:[%s4940_s17 + $0xc0] sm:$0xff]  ;;  %v482_v6 = vrot.slane %v4943_v3, 1  ;;  %v483_v7 = vrot.slane %v4946_v4, 1  ;;  %v4954_v8 = vld [vmem:[%s4940_s17 + $0xc8] sm:$0xff]  ;;  %v485_v12 = vrot.slane %v4958_v10, 1  ;;  %v4966_v14 = vld [vmem:[%s4940_s17 + $0x18] sm:$0xff]  ;;  %s5911_s7 = scalar_lea.vmem %s6737_s2, %s3938_s27 }
  0x1d   : > { %v522_v9 = vrot.slane %v4949_v5, 1  ;;  %v523_v11 = vrot.slane %v4954_v8, 1  ;;  %v4963_v13 = vld [vmem:[%s4940_s17 + $0xd0] sm:$0x3]  ;;  %v4971_v17 = vld [vmem:[%s4940_s17 + $0x20] sm:$0xff]  ;;  %v487_v18 = vrot.slane %v4966_v14, 1 }
  0x1e   : > { %v484_v15 = vsel %vm481_vm1, %v482_v6, %v483_v7  ;;  %v525_v16 = vrot.slane %v4963_v13, 1  ;;  %v4975_v19 = vld [vmem:[%s4940_s17 + $0xd8] sm:$0xff]  ;;  %v4978_v20 = vld [vmem:[%s4940_s17 + $0xe0] sm:$0xff]  ;;  %v486_v23 = vsel %vm481_vm1, %v483_v7, %v485_v12  ;;  %v488_v24 = vrot.slane %v4971_v17, 1  ;;  %v4993_v26 = vld [vmem:[%s4940_s17 + $0x28] sm:$0x3] }
  0x1f   : > { %4239 = vmatprep.mubr.msk.f32.mxu0 %vm564_vm2, %v484_v15  ;;  %v4987_v22 = vsel %vm481_vm1, %v522_v9, %v523_v11  ;;  %v527_v25 = vrot.slane %v4975_v19, 1  ;;  %v4996_v27 = vld [vmem:[%s4940_s17 + $0xe8] sm:$0x3]  ;;  %v528_v30 = vrot.slane %v4978_v20, 1  ;;  %v490_v31 = vrot.slane %v4993_v26, 1  ;;  %v5013_v33 = vld [vmem:[%s4940_s17 + $0x30] sm:$0xff] }
  0x20   : > { %6841 = vst [vmem:[#allocation5_spill] sm:$0xff] %v4987_v22  ;;  %4263 = vmatprep.mubr.msk.f32.mxu1 %vm564_vm2, %v4987_v22  ;;  %4240 = vmatmul.mubr.msk.f32.vlgmr.msra.gmra.mxu0 %vm564_vm2, %v486_v23  ;;  %v5007_v29 = vsel %vm481_vm1, %v523_v11, %v525_v16  ;;  %v530_v32 = vrot.slane %v4996_v27, 1  ;;  %v5016_v34 = vld [vmem:[%s4940_s17 + $0x38] sm:$0xff]  ;;  %v5019_v35 = vld [vmem:[%s4940_s17 + $0xf0] sm:$0xff]  ;;  %v5025_v36 = vsel %vm481_vm1, %v487_v18, %v488_v24  ;;  %v492_v37 = vrot.slane %v5013_v33, 1  ;;  %v5053_v47 = vld [vmem:[%s4940_s17 + $0x48] sm:$0xff] }
  0x21   : > { %6842 = vst [vmem:[#allocation6_spill] sm:$0xff] %v5007_v29  ;;  %4264 = vmatmul.mubr.msk.f32.vlgmr.msra.gmra.mxu1 %vm564_vm2, %v5007_v29  ;;  %4338 = vmatpush3.msk.msra.mxu0 %vm629_vm0, %v3691_v2  ;;  %6843 = vst [vmem:[#allocation7_spill] sm:$0xff] %v5025_v36  ;;  %v493_v38 = vrot.slane %v5016_v34, 1  ;;  %v5030_v39 = vld [vmem:[%s4940_s17 + $0xf8] sm:$0xff]  ;;  %v532_v40 = vrot.slane %v5019_v35, 1  ;;  %v5040_v42 = vsel %vm481_vm1, %v527_v25, %v528_v30  ;;  %v5056_v48 = vld [vmem:[%s4940_s17 + $0x50] sm:$0xff] }
  0x22   : > { %v5034_v41 = vld [vmem:[%s4940_s17 + $0x40] sm:$0x3]  ;;  %4288 = vmatpush3.msk.msra.mxu1 %vm629_vm0, %v432_v1  ;;  %4242 = vmatprep.mubr.msk.f32.mxu0 %vm564_vm2, %v5025_v36  ;;  %6844 = vst [vmem:[#allocation8_spill] sm:$0xff] %v5040_v42  ;;  %v5043_v43 = vsel %vm481_vm1, %v488_v24, %v490_v31  ;;  %v5046_v44 = vsel %vm481_vm1, %v528_v30, %v530_v32  ;;  %v533_v45 = vrot.slane %v5030_v39, 1  ;;  %v497_v52 = vrot.slane %v5053_v47, 1  ;;  %v5067_v53 = vld [vmem:[%s4940_s17 + $0x108] sm:$0xff] }
  0x23   : > { %6845 = vst [vmem:[#allocation9_spill] sm:$0xff] %v5043_v43  ;;  %6846 = vst [vmem:[#allocation10_spill] sm:$0xff] %v5046_v44  ;;  %v5050_v46 = vld [vmem:[%s4940_s17 + $0x100] sm:$0x3]  ;;  %4266 = vmatprep.mubr.msk.f32.mxu1 %vm564_vm2, %v5040_v42  ;;  %v5061_v49 = vsel %vm481_vm1, %v492_v37, %v493_v38  ;;  %v495_v50 = vrot.slane %v5034_v41, 1  ;;  %v5070_v54 = vld [vmem:[%s4940_s17 + $0x110] sm:$0xff]  ;;  %4387 = vmatprep.subr.msk.mxu1 %vm629_vm0, %v4983_v21 }
  0x24   : > { %6847 = vst [vmem:[#allocation11_spill] sm:$0xff] %v5061_v49  ;;  %v535_v51 = vrot.slane %v5050_v46, 1  ;;  %v5073_v55 = vld [vmem:[%s4940_s17 + $0x60] sm:$0xff]  ;;  %4243 = vmatmul.mubr.msk.f32.gmra.mxu0 %vm564_vm2, %v5043_v43  ;;  %v5080_v56 = vsel %vm481_vm1, %v532_v40, %v533_v45  ;;  %v498_v57 = vrot.slane %v5056_v48, 1  ;;  %v537_v58 = vrot.slane %v5067_v53, 1  ;;  %v5089_v61 = vld [vmem:[%s4940_s17 + $0x68] sm:$0xff]  ;;  %4437 = vmatprep.subr.msk.mxu0 %vm629_vm0, %v5001_v28 }
  0x25   : > { %6848 = vst [vmem:[#allocation12_spill] sm:$0xff] %v5080_v56  ;;  %v538_v59 = vrot.slane %v5070_v54, 1  ;;  %v5086_v60 = vld [vmem:[%s4940_s17 + $0x58] sm:$0x3]  ;;  %4267 = vmatmul.mubr.msk.f32.gmra.mxu1 %vm564_vm2, %v5046_v44  ;;  %4245 = vmatprep.mubr.msk.f32.mxu0 %vm564_vm2, %v5061_v49  ;;  %v5098_v62 = vsel %vm481_vm1, %v493_v38, %v495_v50  ;;  %v502_v1 = vrot.slane %v5073_v55, 1  ;;  %v5106_v2 = vld [vmem:[%s4940_s17 + $0x120] sm:$0xff] }
  0x26   : > { %6849 = vst [vmem:[#allocation13_spill] sm:$0xff] %v5098_v62  ;;  %v500_v63 = vrot.slane %v5086_v60, 1  ;;  %v5102_v0 = vld [vmem:[%s4940_s17 + $0x118] sm:$0x3]  ;;  %v5109_v6 = vld [vmem:[%s4940_s17 + $0x128] sm:$0xff]  ;;  %4269 = vmatprep.mubr.msk.f32.mxu1 %vm564_vm2, %v5080_v56  ;;  %v5114_v7 = vsel %vm481_vm1, %v533_v45, %v535_v51  ;;  %v5117_v9 = vsel %vm481_vm1, %v497_v52, %v498_v57  ;;  %v503_v12 = vrot.slane %v5089_v61, 1 }
  0x27   : > { %6850 = vst [vmem:[#allocation14_spill] sm:$0xff] %v5114_v7  ;;  %6851 = vst [vmem:[#allocation15_spill] sm:$0xff] %v5117_v9  ;;  %v540_v11 = vrot.slane %v5102_v0, 1  ;;  %v5122_v15 = vld [vmem:[%s4940_s17 + $0x70] sm:$0x3]  ;;  %v5128_v18 = vsel %vm481_vm1, %v537_v58, %v538_v59  ;;  %v542_v23 = vrot.slane %v5106_v2, 1 }
  0x28   : > { %v5125_v16 = vld [vmem:[%s4940_s17 + $0x130] sm:$0x3]  ;;  %6852 = vst [vmem:[#allocation16_spill] sm:$0xff] %v5128_v18  ;;  %v543_v24 = vrot.slane %v5109_v6, 1  ;;  %v5133_v25 = vld [vmem:[%s4940_s17 + $0x78] sm:$0xff]  ;;  %v5136_v30 = vld [vmem:[%s4940_s17 + $0x80] sm:$0xff]  ;;  %4246 = vmatmul.mubr.msk.f32.gmra.mxu0 %vm564_vm2, %v5098_v62  ;;  %v5151_v37 = vsel %vm481_vm1, %v498_v57, %v500_v63  ;;  %v5161_v50 = vsel %vm481_vm1, %v502_v1, %v503_v12 }
  0x29   : > { %v5141_v31 = vld [vmem:[%s4940_s17 + $0x138] sm:$0xff]  ;;  %v5144_v32 = vld [vmem:[%s4940_s17 + $0x140] sm:$0xff]  ;;  %4270 = vmatmul.mubr.msk.f32.gmra.mxu1 %vm564_vm2, %v5114_v7  ;;  %4248 = vmatprep.mubr.msk.f32.mxu0 %vm564_vm2, %v5117_v9  ;;  %6853 = vst [vmem:[#allocation17_spill] sm:$0xff] %v5151_v37  ;;  %v505_v38 = vrot.slane %v5122_v15, 1  ;;  %v545_v40 = vrot.slane %v5125_v16, 1  ;;  %v5158_v45 = vsel %vm481_vm1, %v538_v59, %v540_v11  ;;  %6855 = vst [vmem:[#allocation19_spill] sm:$0xff] %v5161_v50 }
  0x2a   : > { %4272 = vmatprep.mubr.msk.f32.mxu1 %vm564_vm2, %v5128_v18  ;;  %6854 = vst [vmem:[#allocation18_spill] sm:$0xff] %v5158_v45  ;;  %v507_v51 = vrot.slane %v5133_v25, 1  ;;  %v508_v52 = vrot.slane %v5136_v30, 1  ;;  %v5166_v57 = vld [vmem:[%s4940_s17 + $0x88] sm:$0x3]  ;;  %v5172_v63 = vsel %vm481_vm1, %v542_v23, %v543_v24  ;;  %v547_v7 = vrot.slane %v5141_v31, 1 }
  0x2b   : > { %v5169_v58 = vld [vmem:[%s4940_s17 + $0x148] sm:$0x3]  ;;  %6856 = vst [vmem:[#allocation20_spill] sm:$0xff] %v5172_v63  ;;  %v548_v18 = vrot.slane %v5144_v32, 1  ;;  %v5177_v59 = vld [vmem:[%s4940_s17 + $0x90] sm:$0xff]  ;;  %v5180_v1 = vld [vmem:[%s4940_s17 + $0x98] sm:$0xff]  ;;  %v5195_v23 = vsel %vm481_vm1, %v503_v12, %v505_v38  ;;  %v5202_v29 = vsel %vm481_vm1, %v543_v24, %v545_v40 }
  0x2c   : > { %4249 = vmatmul.mubr.msk.f32.gmra.mxu0 %vm564_vm2, %v5151_v37  ;;  %v5185_v11 = vld [vmem:[%s4940_s17 + $0x150] sm:$0xff]  ;;  %v5188_v56 = vld [vmem:[%s4940_s17 + $0x158] sm:$0xff]  ;;  %6858 = vst [vmem:[#allocation22_spill] sm:$0xff] %v5195_v23  ;;  %v510_v44 = vrot.slane %v5166_v57, 1  ;;  %v550_v42 = vrot.slane %v5169_v58, 1  ;;  %6859 = vst [vmem:[#allocation23_spill] sm:$0xff] %v5202_v29 }
  0x2d   : > { %6857 = vst [vmem:[#allocation21_spill] sm:$0xff] %v5188_v56  ;;  %4273 = vmatmul.mubr.msk.f32.gmra.mxu1 %vm564_vm2, %v5158_v45  ;;  %4251 = vmatprep.mubr.msk.f32.mxu0 %vm564_vm2, %v5161_v50  ;;  %v5205_v45 = vsel %vm481_vm1, %v507_v51, %v508_v52  ;;  %v512_v22 = vrot.slane %v5177_v59, 1  ;;  %v513_v12 = vrot.slane %v5180_v1, 1  ;;  %v5210_v38 = vld [vmem:[%s4940_s17 + $0xa0] sm:$0x3]  ;;  %v5213_v50 = vsel %vm481_vm1, %v547_v7, %v548_v18  ;;  %v5221_v24 = vld [vmem:[%s4940_s17 + $0xa8] sm:$0xff] }
  0x2e   : > { %4275 = vmatprep.mubr.msk.f32.mxu1 %vm564_vm2, %v5172_v63  ;;  %6860 = vst [vmem:[#allocation24_spill] sm:$0xff] %v5205_v45  ;;  %6861 = vst [vmem:[#allocation25_spill] sm:$0xff] %v5213_v50  ;;  %v552_v37 = vrot.slane %v5185_v11, 1  ;;  %v553_v9 = vrot.slane %v5188_v56, 1  ;;  %v5218_v63 = vld [vmem:[%s4940_s17 + $0x160] sm:$0x3]  ;;  %v5239_v7 = vsel %vm481_vm1, %v508_v52, %v510_v44  ;;  %v5242_v49 = vsel %vm481_vm1, %v548_v18, %v550_v42 }
  0x2f   : > { %v5224_v40 = vld [vmem:[%s4940_s17 + $0xb0] sm:$0xff]  ;;  %v5229_v51 = vld [vmem:[%s4940_s17 + $0x168] sm:$0xff]  ;;  %6863 = vst [vmem:[#allocation27_spill] sm:$0xff] %v5239_v7  ;;  %6864 = vst [vmem:[#allocation28_spill] sm:$0xff] %v5242_v49  ;;  %v515_v43 = vrot.slane %v5210_v38, 1  ;;  %v555_v36 = vrot.slane %v5218_v63, 1 }
  0x30   : > { %4252 = vmatmul.mubr.msk.f32.gmra.mxu0 %vm564_vm2, %v5195_v23  ;;  %v5232_v62 = vld [vmem:[%s4940_s17 + $0x170] sm:$0xff]  ;;  %v5248_v23 = vsel %vm481_vm1, %v512_v22, %v513_v12  ;;  %v5254_v56 = vld [vmem:[%s4940_s17 + $0xb8] sm:$0x3]  ;;  %v5257_v44 = vsel %vm481_vm1, %v552_v37, %v553_v9  ;;  %v557_v42 = vrot.slane %v5229_v51, 1  ;;  %s3491_s16 = sshll.u32 %s6551_s13, 4  ;;  %s6690_s21 = scalar_lea.sflag [#allocation3], %s327_s11  ;;  %s6680_s16 = int_to_ptr.vmem [resolvable:$true] %s3491_s16 }
  0x31   : > { %6862 = vst [vmem:[#allocation26_spill] sm:$0xff] %v5232_v62  ;;  %4276 = vmatmul.mubr.msk.f32.gmra.mxu1 %vm564_vm2, %v5202_v29  ;;  %4254 = vmatprep.mubr.msk.f32.mxu0 %vm564_vm2, %v5205_v45  ;;  %6865 = vst [vmem:[#allocation29_spill] sm:$0xff] %v5248_v23  ;;  %v517_v29 = vrot.slane %v5221_v24, 1  ;;  %v518_v45 = vrot.slane %v5224_v40, 1  ;;  %v558_v18 = vrot.slane %v5232_v62, 1  ;;  %v5271_v22 = vsel %vm481_vm1, %v513_v12, %v515_v43  ;;  %s4750_s27 = scalar_lea.vmem %s6680_s16, 4096 }
  0x32   : > { %4278 = vmatprep.mubr.msk.f32.mxu1 %vm564_vm2, %v5213_v50  ;;  %6866 = vst [vmem:[#allocation30_spill] sm:$0xff] %v5257_v44  ;;  %v5262_v52 = vld [vmem:[%s4940_s17 + $0x178] sm:$0x3]  ;;  %6867 = vst [vmem:[#allocation31_spill] sm:$0xff] %v5271_v22  ;;  %v520_v37 = vrot.slane %v5254_v56, 1  ;;  %v1151_v50 = vrot.slane %v4943_v3, 2  ;;  %v5278_v62 = vsel %vm481_vm1, %v553_v9, %v555_v36  ;;  %p4751_p12 = scmp.ne.s32.totalorder %s6680_s16, %s4750_s27 }
  0x33   : > { %6868 = vst [vmem:[#allocation32_spill] sm:$0xff] %v5278_v62  ;;  %v5286_v43 = vsel %vm481_vm1, %v557_v42, %v558_v18  ;;  %v1154_v12 = vrot.slane %v4958_v10, 2  ;;  %v1156_v10 = vrot.slane %v4966_v14, 2  ;;  %v1157_v42 = vrot.slane %v4971_v17, 2  ;;  %s4829_s14 = smov [#allocation2]  }
  0x34   : > { %4255 = vmatmul.mubr.msk.f32.gmra.mxu0 %vm564_vm2, %v5239_v7  ;;  %v5281_v7 = vsel %vm481_vm1, %v517_v29, %v518_v45  ;;  %6870 = vst [vmem:[#allocation34_spill] sm:$0xff] %v5286_v43  ;;  %v5296_v29 = vsel %vm481_vm1, %v518_v45, %v520_v37  ;;  %v1159_v37 = vrot.slane %v4993_v26, 2  ;;  %v1164_v26 = vrot.slane %v5034_v41, 2  ;;  %p4752_p13 = pnand %p4751_p12, %p4902_p4  ;;  %s4754_s29 = sshll.u32 %s4829_s14, 4  ;;  %s4755_s29 = int_to_ptr.vmem [resolvable:$false] %s4754_s29 }
  0x35   : > { %4279 = vmatmul.mubr.msk.f32.gmra.mxu1 %vm564_vm2, %v5242_v49  ;;  %4257 = vmatprep.mubr.msk.f32.mxu0 %vm564_vm2, %v5248_v23  ;;  %6869 = vst [vmem:[#allocation33_spill] sm:$0xff] %v5281_v7  ;;  %v560_v49 = vrot.slane %v5262_v52, 1  ;;  %v1152_v23 = vrot.slane %v4946_v4, 2  ;;  %6871 = vst [vmem:[#allocation35_spill] sm:$0xff] %v5296_v29  ;;  %v1169_v41 = vrot.slane %v5086_v60, 2  ;;  %p4757_p1 = scmp.lt.s32.totalorder %s6680_s16, %s4755_s29 }
  0x36   : > { %4281 = vmatprep.mubr.msk.f32.mxu1 %vm564_vm2, %v5257_v44  ;;  %p4753_p0 = pneg %p4752_p13 }
  0x37   : > { %v5301_v36 = vsel %vm481_vm1, %v558_v18, %v560_v49  ;;  %v1153_v9 = vsel %vm1150_vm3, %v1151_v50, %v1152_v23  ;;  %v1155_v45 = vsel %vm1150_vm3, %v1152_v23, %v1154_v12  ;;  %v1161_v49 = vrot.slane %v5013_v33, 2  ;;  %v5337_v23 = vld [vmem:[%s6738_s3 + $0x18] sm:$0xf] }
  0x38   : > { %4258 = vmatmul.mubr.msk.f32.gmra.mxu0 %vm564_vm2, %v5271_v22  ;;  %6872 = vst [vmem:[#allocation36_spill] sm:$0xff] %v5301_v36  ;;  %v1162_v50 = vrot.slane %v5016_v34, 2  ;;  %v5319_v18 = vsel %vm1150_vm3, %v1156_v10, %v1157_v42  ;;  %v1167_v12 = vrot.slane %v5056_v48, 2 }
  0x39   : > { %4282 = vmatmul.mubr.msk.f32.gmra.mxu1 %vm564_vm2, %v5278_v62  ;;  %4260 = vmatprep.mubr.msk.f32.mxu0 %vm564_vm2, %v5281_v7 }
  0x3a   : > { %4284 = vmatprep.mubr.msk.f32.mxu1 %vm564_vm2, %v5286_v43  ;;  %v5378_v60 = vsel %vm1150_vm3, %v1167_v12, %v1169_v41  ;;  %v1181_v41 = vrot.slane %v5177_v59, 2 }
  0x3c   : > { %4261 = vmatmul.mubr.msk.f32.gmra.mxu0 %vm564_vm2, %v5296_v29 }
  0x3d   : > { %4285 = vmatmul.mubr.msk.f32.gmra.mxu1 %vm564_vm2, %v5301_v36  ;;  %4339 = vmatprep.mubr.msk.f32.mxu0 %vm564_vm2, %v1153_v9  ;;  %v5324_v9 = vld [vmem:[%s6738_s3 + $0x14] sm:$0xf] }
  0x3e   : > { %4289 = vmatprep.mubr.msk.f32.mxu1 %vm564_vm2, %v4943_v3  ;;  %v5331_v3 = vsel %vm1150_vm3, %v1157_v42, %v1159_v37  ;;  %v1171_v42 = vrot.slane %v5073_v55, 2  ;;  %v1174_v37 = vrot.slane %v5122_v15, 2 }
  0x40   : > { %4340 = vmatmul.mubr.msk.f32.vlgmr.msra.gmra.mxu0 %vm564_vm2, %v1155_v45  ;;  %v1172_v45 = vrot.slane %v5089_v61, 2 }
  0x41   : > { %4290 = vmatmul.mubr.msk.f32.vlgmr.msra.gmra.mxu1 %vm564_vm2, %v4946_v4  ;;  %4438 = vmatpush3.msk.msra.mxu0 %vm629_vm0, %v5001_v28  ;;  %v5344_v4 = vsel %vm1150_vm3, %v1161_v49, %v1162_v50  ;;  %v1166_v28 = vrot.slane %v5053_v47, 2 }
  0x42   : > { %4388 = vmatpush3.msk.msra.mxu1 %vm629_vm0, %v4983_v21  ;;  %4292 = vmatprep.mubr.msk.f32.mxu1 %vm564_vm2, %v4966_v14  ;;  %v5361_v21 = vsel %vm1150_vm3, %v1162_v50, %v1164_v26  ;;  %v5384_v49 = vsel %vm1150_vm3, %v1171_v42, %v1172_v45  ;;  %v1176_v50 = vrot.slane %v5133_v25, 2  ;;  %v1177_v26 = vrot.slane %v5136_v30, 2 }
  0x43   : > { %4342 = vmatprep.mubr.msk.f32.mxu0 %vm564_vm2, %v5319_v18  ;;  %4487 = vmatprep.subr.msk.mxu1 %vm629_vm0, %v5324_v9  ;;  %v5367_v10 = vsel %vm1150_vm3, %v1166_v28, %v1167_v12  ;;  %v5395_v15 = vsel %vm1150_vm3, %v1172_v45, %v1174_v37  ;;  %v1179_v28 = vrot.slane %v5166_v57, 2  ;;  %v1182_v42 = vrot.slane %v5180_v1, 2 }
  0x44   : > { %4343 = vmatmul.mubr.msk.f32.gmra.mxu0 %vm564_vm2, %v5331_v3  ;;  %4537 = vmatprep.subr.msk.mxu0 %vm629_vm0, %v5337_v23  ;;  %6873 = vst [vmem:[#allocation37_spill] sm:$0xff] %v5395_v15  ;;  %v5401_v12 = vsel %vm1150_vm3, %v1176_v50, %v1177_v26  ;;  %v1184_v45 = vrot.slane %v5210_v38, 2  ;;  %v1186_v50 = vrot.slane %v5221_v24, 2 }
  0x45   : > { %4293 = vmatmul.mubr.msk.f32.gmra.mxu1 %vm564_vm2, %v4971_v17  ;;  %4345 = vmatprep.mubr.msk.f32.mxu0 %vm564_vm2, %v5344_v4  ;;  %v5412_v57 = vsel %vm1150_vm3, %v1177_v26, %v1179_v28  ;;  %v5418_v37 = vsel %vm1150_vm3, %v1181_v41, %v1182_v42  ;;  %v1189_v26 = vrot.slane %v5254_v56, 2  ;;  %v1191_v41 = vrot.slane %v4949_v5, 2 }
  0x46   : > { %4295 = vmatprep.mubr.msk.f32.mxu1 %vm564_vm2, %v5013_v33  ;;  %6874 = vst [vmem:[#allocation38_spill] sm:$0xff] %v5412_v57  ;;  %v5429_v38 = vsel %vm1150_vm3, %v1182_v42, %v1184_v45  ;;  %v1194_v42 = vrot.slane %v4963_v13, 2 }
  0x47   : > { %6875 = vst [vmem:[#allocation39_spill] sm:$0xff] %v5429_v38 }
  0x48   : > { %4346 = vmatmul.mubr.msk.f32.gmra.mxu0 %vm564_vm2, %v5361_v21 }
  0x49   : > { %4296 = vmatmul.mubr.msk.f32.gmra.mxu1 %vm564_vm2, %v5016_v34  ;;  %4348 = vmatprep.mubr.msk.f32.mxu0 %vm564_vm2, %v5367_v10 }
  0x4a   : > { %4298 = vmatprep.mubr.msk.f32.mxu1 %vm564_vm2, %v5053_v47 }
  0x4c   : > { %4349 = vmatmul.mubr.msk.f32.gmra.mxu0 %vm564_vm2, %v5378_v60 }
  0x4d   : > { %4299 = vmatmul.mubr.msk.f32.gmra.mxu1 %vm564_vm2, %v5056_v48  ;;  %4351 = vmatprep.mubr.msk.f32.mxu0 %vm564_vm2, %v5384_v49 }
  0x4e   : > { %4301 = vmatprep.mubr.msk.f32.mxu1 %vm564_vm2, %v5073_v55 }
  0x50   : > { %4352 = vmatmul.mubr.msk.f32.gmra.mxu0 %vm564_vm2, %v5395_v15  ;;  %v1187_v15 = vrot.slane %v5224_v40, 2 }
  0x51   : > { %4302 = vmatmul.mubr.msk.f32.gmra.mxu1 %vm564_vm2, %v5089_v61  ;;  %4354 = vmatprep.mubr.msk.f32.mxu0 %vm564_vm2, %v5401_v12 }
  0x52   : > { %4304 = vmatprep.mubr.msk.f32.mxu1 %vm564_vm2, %v5133_v25  ;;  %v5435_v28 = vsel %vm1150_vm3, %v1186_v50, %v1187_v15  ;;  %v5446_v56 = vsel %vm1150_vm3, %v1187_v15, %v1189_v26  ;;  %v1196_v50 = vrot.slane %v4975_v19, 2  ;;  %v1199_v15 = vrot.slane %v4996_v27, 2 }
  0x53   : > { %6876 = vst [vmem:[#allocation40_spill] sm:$0xff] %v5446_v56 }
  0x54   : > { %4355 = vmatmul.mubr.msk.f32.gmra.mxu0 %vm564_vm2, %v5412_v57  ;;  %v1192_v57 = vrot.slane %v4954_v8, 2 }
  0x55   : > { %4305 = vmatmul.mubr.msk.f32.gmra.mxu1 %vm564_vm2, %v5136_v30  ;;  %4357 = vmatprep.mubr.msk.f32.mxu0 %vm564_vm2, %v5418_v37 }
  0x56   : > { %4307 = vmatprep.mubr.msk.f32.mxu1 %vm564_vm2, %v5177_v59  ;;  %v5452_v45 = vsel %vm1150_vm3, %v1191_v41, %v1192_v57  ;;  %v5463_v13 = vsel %vm1150_vm3, %v1192_v57, %v1194_v42  ;;  %v1201_v41 = vrot.slane %v5019_v35, 2  ;;  %v1204_v57 = vrot.slane %v5050_v46, 2 }
  0x57   : > { %6877 = vst [vmem:[#allocation41_spill] sm:$0xff] %v5463_v13 }
  0x58   : > { %4358 = vmatmul.mubr.msk.f32.gmra.mxu0 %vm564_vm2, %v5429_v38  ;;  %v1197_v38 = vrot.slane %v4978_v20, 2 }
  0x59   : > { %4308 = vmatmul.mubr.msk.f32.gmra.mxu1 %vm564_vm2, %v5180_v1  ;;  %4360 = vmatprep.mubr.msk.f32.mxu0 %vm564_vm2, %v5435_v28 }
  0x5a   : > { %4310 = vmatprep.mubr.msk.f32.mxu1 %vm564_vm2, %v5221_v24  ;;  %v5469_v26 = vsel %vm1150_vm3, %v1196_v50, %v1197_v38  ;;  %v5480_v27 = vsel %vm1150_vm3, %v1197_v38, %v1199_v15  ;;  %v1206_v50 = vrot.slane %v5067_v53, 2  ;;  %v1209_v38 = vrot.slane %v5102_v0, 2 }
  0x5b   : > { %6878 = vst [vmem:[#allocation42_spill] sm:$0xff] %v5480_v27 }
  0x5c   : > { %4361 = vmatmul.mubr.msk.f32.gmra.mxu0 %vm564_vm2, %v5446_v56  ;;  %v1202_v56 = vrot.slane %v5030_v39, 2 }
  0x5d   : > { %4311 = vmatmul.mubr.msk.f32.gmra.mxu1 %vm564_vm2, %v5224_v40  ;;  %4363 = vmatprep.mubr.msk.f32.mxu0 %vm564_vm2, %v5452_v45 }
  0x5e   : > { %4313 = vmatprep.mubr.msk.f32.mxu1 %vm564_vm2, %v4949_v5  ;;  %v5486_v42 = vsel %vm1150_vm3, %v1201_v41, %v1202_v56  ;;  %v5497_v46 = vsel %vm1150_vm3, %v1202_v56, %v1204_v57  ;;  %v1211_v41 = vrot.slane %v5106_v2, 2  ;;  %v1214_v56 = vrot.slane %v5125_v16, 2 }
  0x5f   : > { %6879 = vst [vmem:[#allocation43_spill] sm:$0xff] %v5497_v46 }
  0x60   : > { %4364 = vmatmul.mubr.msk.f32.gmra.mxu0 %vm564_vm2, %v5463_v13  ;;  %v1207_v13 = vrot.slane %v5070_v54, 2 }
  0x61   : > { %4314 = vmatmul.mubr.msk.f32.gmra.mxu1 %vm564_vm2, %v4954_v8  ;;  %4366 = vmatprep.mubr.msk.f32.mxu0 %vm564_vm2, %v5469_v26 }
  0x62   : > { %4316 = vmatprep.mubr.msk.f32.mxu1 %vm564_vm2, %v4975_v19  ;;  %v5503_v15 = vsel %vm1150_vm3, %v1206_v50, %v1207_v13  ;;  %v5514_v0 = vsel %vm1150_vm3, %v1207_v13, %v1209_v38  ;;  %v1216_v50 = vrot.slane %v5141_v31, 2  ;;  %v1219_v13 = vrot.slane %v5169_v58, 2 }
  0x63   : > { %6880 = vst [vmem:[#allocation44_spill] sm:$0xff] %v5503_v15  ;;  %6881 = vst [vmem:[#allocation45_spill] sm:$0xff] %v5514_v0 }
  0x64   : > { %4367 = vmatmul.mubr.msk.f32.gmra.mxu0 %vm564_vm2, %v5480_v27  ;;  %v1212_v27 = vrot.slane %v5109_v6, 2 }
  0x65   : > { %4317 = vmatmul.mubr.msk.f32.gmra.mxu1 %vm564_vm2, %v4978_v20  ;;  %4369 = vmatprep.mubr.msk.f32.mxu0 %vm564_vm2, %v5486_v42 }
  0x66   : > { %4319 = vmatprep.mubr.msk.f32.mxu1 %vm564_vm2, %v5019_v35  ;;  %v5520_v57 = vsel %vm1150_vm3, %v1211_v41, %v1212_v27  ;;  %v5531_v16 = vsel %vm1150_vm3, %v1212_v27, %v1214_v56  ;;  %v1221_v41 = vrot.slane %v5185_v11, 2  ;;  %v1224_v27 = vrot.slane %v5218_v63, 2 }
  0x67   : > { %6882 = vst [vmem:[#allocation46_spill] sm:$0xff] %v5520_v57  ;;  %6883 = vst [vmem:[#allocation47_spill] sm:$0xff] %v5531_v16 }
  0x68   : > { %4370 = vmatmul.mubr.msk.f32.gmra.mxu0 %vm564_vm2, %v5497_v46  ;;  %v1217_v46 = vrot.slane %v5144_v32, 2 }
  0x69   : > { %4320 = vmatmul.mubr.msk.f32.gmra.mxu1 %vm564_vm2, %v5030_v39  ;;  %4372 = vmatprep.mubr.msk.f32.mxu0 %vm564_vm2, %v5503_v15 }
  0x6a   : > { %4322 = vmatprep.mubr.msk.f32.mxu1 %vm564_vm2, %v5067_v53  ;;  %v5537_v38 = vsel %vm1150_vm3, %v1216_v50, %v1217_v46  ;;  %v5548_v58 = vsel %vm1150_vm3, %v1217_v46, %v1219_v13  ;;  %v1226_v50 = vrot.slane %v5229_v51, 2  ;;  %v1229_v46 = vrot.slane %v5262_v52, 2  ;;  %v6887_v52 = vld [vmem:[#allocation7_spill] sm:$0xff] }
  0x6c   : > { %4373 = vmatmul.mubr.msk.f32.gmra.mxu0 %vm564_vm2, %v5514_v0  ;;  %v6884_v0 = vld [vmem:[#allocation21_spill] sm:$0xff] }
  0x6d   : > { %4323 = vmatmul.mubr.msk.f32.gmra.mxu1 %vm564_vm2, %v5070_v54  ;;  %4375 = vmatprep.mubr.msk.f32.mxu0 %vm564_vm2, %v5520_v57  ;;  %v1222_v15 = vrot.slane %v6884_v0, 2 }
  0x6e   : > { %4325 = vmatprep.mubr.msk.f32.mxu1 %vm564_vm2, %v5106_v2 }
  0x6f   : > { %v5554_v56 = vsel %vm1150_vm3, %v1221_v41, %v1222_v15  ;;  %v5565_v63 = vsel %vm1150_vm3, %v1222_v15, %v1224_v27  ;;  %v6888_v41 = vld [vmem:[#allocation9_spill] sm:$0xff] }
  0x70   : > { %4376 = vmatmul.mubr.msk.f32.gmra.mxu0 %vm564_vm2, %v5531_v16  ;;  %v6885_v16 = vld [vmem:[#allocation26_spill] sm:$0xff]  ;;  %v5606_v27 = vld [vmem:[%s6738_s3 + $0x20] sm:$0xf] }
  0x71   : > { %4326 = vmatmul.mubr.msk.f32.gmra.mxu1 %vm564_vm2, %v5109_v6  ;;  %4378 = vmatprep.mubr.msk.f32.mxu0 %vm564_vm2, %v5537_v38  ;;  %v1227_v57 = vrot.slane %v6885_v16, 2 }
  0x72   : > { %4328 = vmatprep.mubr.msk.f32.mxu1 %vm564_vm2, %v5141_v31 }
  0x73   : > { %v5571_v13 = vsel %vm1150_vm3, %v1226_v50, %v1227_v57  ;;  %v5580_v15 = vsel %vm1150_vm3, %v1227_v57, %v1229_v46  ;;  %v5597_v57 = vld [vmem:[%s6738_s3 + $0x1c] sm:$0xf]  ;;  %v6893_v50 = vld [vmem:[#allocation19_spill] sm:$0xff]  ;;  %v6894_v46 = vld [vmem:[#allocation22_spill] sm:$0xff] }
  0x74   : > { %4379 = vmatmul.mubr.msk.f32.gmra.mxu0 %vm564_vm2, %v5548_v58  ;;  %6886 = vst [vmem:[#allocation21_spill] sm:$0xff] %v5580_v15 }
  0x75   : > { %4329 = vmatmul.mubr.msk.f32.gmra.mxu1 %vm564_vm2, %v5144_v32  ;;  %4381 = vmatprep.mubr.msk.f32.mxu0 %vm564_vm2, %v5554_v56 }
  0x76   : > { %4331 = vmatprep.mubr.msk.f32.mxu1 %vm564_vm2, %v5185_v11 }
  0x78   : > { %4382 = vmatmul.mubr.msk.f32.gmra.mxu0 %vm564_vm2, %v5565_v63 }
  0x79   : > { %4332 = vmatmul.mubr.msk.f32.gmra.mxu1 %vm564_vm2, %v6884_v0  ;;  %4384 = vmatprep.mubr.msk.f32.mxu0 %vm564_vm2, %v5571_v13 }
  0x7a   : > { %4334 = vmatprep.mubr.msk.f32.mxu1 %vm564_vm2, %v5229_v51 }
  0x7c   : > { %4385 = vmatmul.mubr.msk.f32.gmra.mxu0 %vm564_vm2, %v5580_v15 }
  0x7d   : > { %4335 = vmatmul.mubr.msk.f32.gmra.mxu1 %vm564_vm2, %v6885_v16  ;;  %4439 = vmatprep.mubr.msk.f32.mxu0 %vm564_vm2, %v6887_v52  ;;  %v6895_v52 = vld [vmem:[#allocation24_spill] sm:$0xff] }
  0x7e   : > { %4389 = vmatprep.mubr.msk.f32.mxu1 %vm564_vm2, %v4966_v14  ;;  %v6889_v14 = vld [vmem:[#allocation11_spill] sm:$0xff] }
  0x80   : > { %4440 = vmatmul.mubr.msk.f32.vlgmr.msra.gmra.mxu0 %vm564_vm2, %v6888_v41  ;;  %v6896_v41 = vld [vmem:[#allocation27_spill] sm:$0xff] }
  0x81   : > { %4390 = vmatmul.mubr.msk.f32.vlgmr.msra.gmra.mxu1 %vm564_vm2, %v4971_v17  ;;  %4538 = vmatpush3.msk.msra.mxu0 %vm629_vm0, %v5337_v23  ;;  %v6890_v17 = vld [vmem:[#allocation13_spill] sm:$0xff]  ;;  %v6891_v23 = vld [vmem:[#allocation15_spill] sm:$0xff] }
  0x82   : > { %4488 = vmatpush3.msk.msra.mxu1 %vm629_vm0, %v5324_v9  ;;  %4392 = vmatprep.mubr.msk.f32.mxu1 %vm564_vm2, %v5013_v33  ;;  %v6892_v9 = vld [vmem:[#allocation17_spill] sm:$0xff] }
  0x83   : > { %4442 = vmatprep.mubr.msk.f32.mxu0 %vm564_vm2, %v6889_v14  ;;  %4587 = vmatprep.subr.msk.mxu1 %vm629_vm0, %v5597_v57 }
  0x84   : > { %4443 = vmatmul.mubr.msk.f32.gmra.mxu0 %vm564_vm2, %v6890_v17  ;;  %4637 = vmatprep.subr.msk.mxu0 %vm629_vm0, %v5606_v27 }
  0x85   : > { %4393 = vmatmul.mubr.msk.f32.gmra.mxu1 %vm564_vm2, %v5016_v34  ;;  %4445 = vmatprep.mubr.msk.f32.mxu0 %vm564_vm2, %v6891_v23 }
  0x86   : > { %4395 = vmatprep.mubr.msk.f32.mxu1 %vm564_vm2, %v5053_v47 }
  0x88   : > { %4446 = vmatmul.mubr.msk.f32.gmra.mxu0 %vm564_vm2, %v6892_v9 }
  0x89   : > { %4396 = vmatmul.mubr.msk.f32.gmra.mxu1 %vm564_vm2, %v5056_v48  ;;  %4448 = vmatprep.mubr.msk.f32.mxu0 %vm564_vm2, %v6893_v50  ;;  %v6897_v50 = vld [vmem:[#allocation29_spill] sm:$0xff] }
  0x8a   : > { %4398 = vmatprep.mubr.msk.f32.mxu1 %vm564_vm2, %v5073_v55 }
  0x8c   : > { %4449 = vmatmul.mubr.msk.f32.gmra.mxu0 %vm564_vm2, %v6894_v46 }
  0x8d   : > { %4399 = vmatmul.mubr.msk.f32.gmra.mxu1 %vm564_vm2, %v5089_v61  ;;  %4451 = vmatprep.mubr.msk.f32.mxu0 %vm564_vm2, %v6895_v52 }
  0x8e   : > { %4401 = vmatprep.mubr.msk.f32.mxu1 %vm564_vm2, %v5133_v25 }
  0x90   : > { %4452 = vmatmul.mubr.msk.f32.gmra.mxu0 %vm564_vm2, %v6896_v41  ;;  %v6909_v41 = vld [vmem:[#allocation28_spill] sm:$0xff] }
  0x91   : > { %4402 = vmatmul.mubr.msk.f32.gmra.mxu1 %vm564_vm2, %v5136_v30  ;;  %4454 = vmatprep.mubr.msk.f32.mxu0 %vm564_vm2, %v6897_v50  ;;  %v6898_v50 = vld [vmem:[#allocation5_spill] sm:$0xff] }
  0x92   : > { %4404 = vmatprep.mubr.msk.f32.mxu1 %vm564_vm2, %v5177_v59 }
  0x94   : > { %4455 = vmatmul.mubr.msk.f32.gmra.mxu0 %vm564_vm2, %v5271_v22  ;;  %v6899_v22 = vld [vmem:[#allocation6_spill] sm:$0xff] }
  0x95   : > { %4405 = vmatmul.mubr.msk.f32.gmra.mxu1 %vm564_vm2, %v5180_v1  ;;  %4457 = vmatprep.mubr.msk.f32.mxu0 %vm564_vm2, %v5281_v7  ;;  %v6900_v7 = vld [vmem:[#allocation8_spill] sm:$0xff] }
  0x96   : > { %4407 = vmatprep.mubr.msk.f32.mxu1 %vm564_vm2, %v5221_v24 }
  0x98   : > { %4458 = vmatmul.mubr.msk.f32.gmra.mxu0 %vm564_vm2, %v5296_v29  ;;  %v6901_v29 = vld [vmem:[#allocation10_spill] sm:$0xff] }
  0x99   : > { %4408 = vmatmul.mubr.msk.f32.gmra.mxu1 %vm564_vm2, %v5224_v40  ;;  %4460 = vmatprep.mubr.msk.f32.mxu0 %vm564_vm2, %v6898_v50  ;;  %v6902_v50 = vld [vmem:[#allocation12_spill] sm:$0xff] }
  0x9a   : > { %4410 = vmatprep.mubr.msk.f32.mxu1 %vm564_vm2, %v4949_v5 }
  0x9c   : > { %4461 = vmatmul.mubr.msk.f32.gmra.mxu0 %vm564_vm2, %v6899_v22  ;;  %v6903_v22 = vld [vmem:[#allocation14_spill] sm:$0xff] }
  0x9d   : > { %4411 = vmatmul.mubr.msk.f32.gmra.mxu1 %vm564_vm2, %v4954_v8  ;;  %4463 = vmatprep.mubr.msk.f32.mxu0 %vm564_vm2, %v6900_v7  ;;  %v6904_v7 = vld [vmem:[#allocation16_spill] sm:$0xff] }
  0x9e   : > { %4413 = vmatprep.mubr.msk.f32.mxu1 %vm564_vm2, %v4975_v19 }
  0xa0   : > { %4464 = vmatmul.mubr.msk.f32.gmra.mxu0 %vm564_vm2, %v6901_v29  ;;  %v6905_v29 = vld [vmem:[#allocation18_spill] sm:$0xff] }
  0xa1   : > { %4414 = vmatmul.mubr.msk.f32.gmra.mxu1 %vm564_vm2, %v4978_v20  ;;  %4466 = vmatprep.mubr.msk.f32.mxu0 %vm564_vm2, %v6902_v50  ;;  %v6906_v50 = vld [vmem:[#allocation20_spill] sm:$0xff] }
  0xa2   : > { %4416 = vmatprep.mubr.msk.f32.mxu1 %vm564_vm2, %v5019_v35 }
  0xa4   : > { %4467 = vmatmul.mubr.msk.f32.gmra.mxu0 %vm564_vm2, %v6903_v22  ;;  %v6907_v22 = vld [vmem:[#allocation23_spill] sm:$0xff] }
  0xa5   : > { %4417 = vmatmul.mubr.msk.f32.gmra.mxu1 %vm564_vm2, %v5030_v39  ;;  %4469 = vmatprep.mubr.msk.f32.mxu0 %vm564_vm2, %v6904_v7  ;;  %v5712_v7 = vld [vmem:[%s361_s25 + $0x8] sm:$0xff] }
  0xa6   : > { %4419 = vmatprep.mubr.msk.f32.mxu1 %vm564_vm2, %v5067_v53  ;;  %v1827_v52 = vrot.slane %v5712_v7, 1 }
  0xa8   : > { %4470 = vmatmul.mubr.msk.f32.gmra.mxu0 %vm564_vm2, %v6905_v29  ;;  %v6908_v29 = vld [vmem:[#allocation25_spill] sm:$0xff] }
  0xa9   : > { %4420 = vmatmul.mubr.msk.f32.gmra.mxu1 %vm564_vm2, %v5070_v54  ;;  %4472 = vmatprep.mubr.msk.f32.mxu0 %vm564_vm2, %v6906_v50  ;;  %v5710_v50 = vld [vmem:[%s361_s25] sm:$0xff] }
  0xaa   : > { %4422 = vmatprep.mubr.msk.f32.mxu1 %vm564_vm2, %v5106_v2 }
  0xac   : > { %4473 = vmatmul.mubr.msk.f32.gmra.mxu0 %vm564_vm2, %v6907_v22  ;;  %v1826_v22 = vrot.slane %v5710_v50, 1 }
  0xad   : > { %4423 = vmatmul.mubr.msk.f32.gmra.mxu1 %vm564_vm2, %v5109_v6  ;;  %4475 = vmatprep.mubr.msk.f32.mxu0 %vm564_vm2, %v6908_v29  ;;  %v5722_v29 = vld [vmem:[%s361_s25 + $0x10] sm:$0x3]  ;;  %s6678_s25 = scalar_lea.hbm %s6740_s5, %s3939_s15 }
  0xae   : > { %4425 = vmatprep.mubr.msk.f32.mxu1 %vm564_vm2, %v5141_v31 }
  0xb0   : > { %4476 = vmatmul.mubr.msk.f32.gmra.mxu0 %vm564_vm2, %v6909_v41  ;;  %v5736_v41 = vsel %vm481_vm1, %v1826_v22, %v1827_v52 }
  0xb1   : > { %4426 = vmatmul.mubr.msk.f32.gmra.mxu1 %vm564_vm2, %v5144_v32  ;;  %4478 = vmatprep.mubr.msk.f32.mxu0 %vm564_vm2, %v5257_v44  ;;  %v1829_v44 = vrot.slane %v5722_v29, 1  ;;  %6910 = vst [vmem:[#allocation26_spill] sm:$0xff] %v5736_v41 }
  0xb2   : > { %4428 = vmatprep.mubr.msk.f32.mxu1 %vm564_vm2, %v5185_v11 }
  0xb4   : > { %4479 = vmatmul.mubr.msk.f32.gmra.mxu0 %vm564_vm2, %v5278_v62  ;;  %v5745_v62 = vsel %vm481_vm1, %v1827_v52, %v1829_v44 }
  0xb5   : > { %4429 = vmatmul.mubr.msk.f32.gmra.mxu1 %vm564_vm2, %v6884_v0  ;;  %4481 = vmatprep.mubr.msk.f32.mxu0 %vm564_vm2, %v5286_v43  ;;  %6911 = vst [vmem:[#allocation48_spill] sm:$0xff] %v5745_v62 }
  0xb6   : > { %4431 = vmatprep.mubr.msk.f32.mxu1 %vm564_vm2, %v5229_v51 }
  0xb8   : > { %4482 = vmatmul.mubr.msk.f32.gmra.mxu0 %vm564_vm2, %v5301_v36  ;;  %v5928_v36 = vld [vmem:[%s5911_s7] sm:$0xff] }
  0xb9   : > { %4432 = vmatmul.mubr.msk.f32.gmra.mxu1 %vm564_vm2, %v6885_v16  ;;  %4484 = vmatprep.mubr.msk.f32.mxu0 %vm564_vm2, %v5736_v41 }
  0xba   : > { %4434 = vmatprep.mubr.msk.f32.mxu1 %vm564_vm2, %v5710_v50 }
  0xbc   : > { %4485 = vmatmul.mubr.msk.f32.gmra.mxu0 %vm564_vm2, %v5745_v62 }
  0xbd   : > { %4435 = vmatmul.mubr.msk.f32.gmra.mxu1 %vm564_vm2, %v5712_v7  ;;  %4539 = vmatprep.mubr.msk.f32.mxu0 %vm564_vm2, %v5013_v33  ;;  %v6912_v33 = vld [vmem:[#allocation37_spill] sm:$0xff] }
  0xbe   : > { %4489 = vmatprep.mubr.msk.f32.mxu1 %vm564_vm2, %v5319_v18  ;;  %v6922_v18 = vld [vmem:[#allocation47_spill] sm:$0xff] }
  0xc0   : > { %4540 = vmatmul.mubr.msk.f32.vlgmr.msra.gmra.mxu0 %vm564_vm2, %v5016_v34  ;;  %v6913_v34 = vld [vmem:[#allocation38_spill] sm:$0xff] }
  0xc1   : > { %4490 = vmatmul.mubr.msk.f32.vlgmr.msra.gmra.mxu1 %vm564_vm2, %v5331_v3  ;;  %4638 = vmatpush3.msk.msra.mxu0 %vm629_vm0, %v5606_v27 }
  0xc2   : > { %4588 = vmatpush3.msk.msra.mxu1 %vm629_vm0, %v5597_v57  ;;  %4492 = vmatprep.mubr.msk.f32.mxu1 %vm564_vm2, %v5344_v4  ;;  %v2129_v57 = vrot.slane %v5710_v50, 2 }
  0xc3   : > { %4542 = vmatprep.mubr.msk.f32.mxu0 %vm564_vm2, %v5053_v47  ;;  %v6914_v47 = vld [vmem:[#allocation39_spill] sm:$0xff] }
  0xc4   : > { %4543 = vmatmul.mubr.msk.f32.gmra.mxu0 %vm564_vm2, %v5056_v48  ;;  %v6915_v48 = vld [vmem:[#allocation40_spill] sm:$0xff] }
  0xc5   : > { %4493 = vmatmul.mubr.msk.f32.gmra.mxu1 %vm564_vm2, %v5361_v21  ;;  %4545 = vmatprep.mubr.msk.f32.mxu0 %vm564_vm2, %v5073_v55  ;;  %v6916_v55 = vld [vmem:[#allocation41_spill] sm:$0xff] }
  0xc6   : > { %4495 = vmatprep.mubr.msk.f32.mxu1 %vm564_vm2, %v5367_v10 }
  0xc8   : > { %4546 = vmatmul.mubr.msk.f32.gmra.mxu0 %vm564_vm2, %v5089_v61 }
  0xc9   : > { %4496 = vmatmul.mubr.msk.f32.gmra.mxu1 %vm564_vm2, %v5378_v60  ;;  %4548 = vmatprep.mubr.msk.f32.mxu0 %vm564_vm2, %v5133_v25  ;;  %v6918_v25 = vld [vmem:[#allocation43_spill] sm:$0xff] }
  0xca   : > { %4498 = vmatprep.mubr.msk.f32.mxu1 %vm564_vm2, %v5384_v49 }
  0xcc   : > { %4549 = vmatmul.mubr.msk.f32.gmra.mxu0 %vm564_vm2, %v5136_v30  ;;  %v6919_v30 = vld [vmem:[#allocation44_spill] sm:$0xff] }
  0xcd   : > { %4499 = vmatmul.mubr.msk.f32.gmra.mxu1 %vm564_vm2, %v6912_v33  ;;  %4551 = vmatprep.mubr.msk.f32.mxu0 %vm564_vm2, %v5177_v59 }
  0xce   : > { %4501 = vmatprep.mubr.msk.f32.mxu1 %vm564_vm2, %v5401_v12 }
  0xd0   : > { %4552 = vmatmul.mubr.msk.f32.gmra.mxu0 %vm564_vm2, %v5180_v1 }
  0xd1   : > { %4502 = vmatmul.mubr.msk.f32.gmra.mxu1 %vm564_vm2, %v6913_v34  ;;  %4554 = vmatprep.mubr.msk.f32.mxu0 %vm564_vm2, %v5221_v24  ;;  %v6920_v24 = vld [vmem:[#allocation45_spill] sm:$0xff] }
  0xd2   : > { %4504 = vmatprep.mubr.msk.f32.mxu1 %vm564_vm2, %v5418_v37 }
  0xd4   : > { %4555 = vmatmul.mubr.msk.f32.gmra.mxu0 %vm564_vm2, %v5224_v40  ;;  %v6921_v40 = vld [vmem:[#allocation46_spill] sm:$0xff] }
  0xd5   : > { %4505 = vmatmul.mubr.msk.f32.gmra.mxu1 %vm564_vm2, %v6914_v47  ;;  %4557 = vmatprep.mubr.msk.f32.mxu0 %vm564_vm2, %v4949_v5 }
  0xd6   : > { %4507 = vmatprep.mubr.msk.f32.mxu1 %vm564_vm2, %v5435_v28 }
  0xd8   : > { %4558 = vmatmul.mubr.msk.f32.gmra.mxu0 %vm564_vm2, %v4954_v8 }
  0xd9   : > { %4508 = vmatmul.mubr.msk.f32.gmra.mxu1 %vm564_vm2, %v6915_v48  ;;  %4560 = vmatprep.mubr.msk.f32.mxu0 %vm564_vm2, %v4975_v19  ;;  %v6917_v19 = vld [vmem:[#allocation42_spill] sm:$0xff] }
  0xda   : > { %4510 = vmatprep.mubr.msk.f32.mxu1 %vm564_vm2, %v5452_v45 }
  0xdc   : > { %4561 = vmatmul.mubr.msk.f32.gmra.mxu0 %vm564_vm2, %v4978_v20 }
  0xdd   : > { %4511 = vmatmul.mubr.msk.f32.gmra.mxu1 %vm564_vm2, %v6916_v55  ;;  %4563 = vmatprep.mubr.msk.f32.mxu0 %vm564_vm2, %v5019_v35 }
  0xde   : > { %4513 = vmatprep.mubr.msk.f32.mxu1 %vm564_vm2, %v5469_v26 }
  0xe0   : > { %v5825_v5 = vpop.f32.mrf.mxu0  ;;  %4564 = vmatmul.mubr.msk.f32.gmra.mxu0 %vm564_vm2, %v5030_v39 }
  0xe1   : > { %v5829_v8 = vpop.f32.mrf.mxu1  ;;  %4514 = vmatmul.mubr.msk.f32.gmra.mxu1 %vm564_vm2, %v6917_v19  ;;  %4566 = vmatprep.mubr.msk.f32.mxu0 %vm564_vm2, %v5067_v53 }
  0xe2   : > { %v5835_v20 = vpop.f32.mrf.mxu0  ;;  %4516 = vmatprep.mubr.msk.f32.mxu1 %vm564_vm2, %v5486_v42 }
  0xe3   : > { %v5839_v35 = vpop.f32.mrf.mxu1 }
  0xe4   : > { %v5841_v61 = vpop.f32.mrf.mxu0  ;;  %4567 = vmatmul.mubr.msk.f32.gmra.mxu0 %vm564_vm2, %v5070_v54 }
  0xe5   : > { %v5845_v39 = vpop.f32.mrf.mxu1  ;;  %4517 = vmatmul.mubr.msk.f32.gmra.mxu1 %vm564_vm2, %v6918_v25  ;;  %4569 = vmatprep.mubr.msk.f32.mxu0 %vm564_vm2, %v5106_v2 }
  0xe6   : > { %v5851_v53 = vpop.f32.mrf.mxu0  ;;  %4519 = vmatprep.mubr.msk.f32.mxu1 %vm564_vm2, %v6919_v30 }
  0xe7   : > { %v5855_v59 = vpop.f32.mrf.mxu1 }
  0xe8   : > { %v5857_v1 = vpop.f32.mrf.mxu0  ;;  %4570 = vmatmul.mubr.msk.f32.gmra.mxu0 %vm564_vm2, %v5109_v6 }
  0xe9   : > { %v5861_v54 = vpop.f32.mrf.mxu1  ;;  %4520 = vmatmul.mubr.msk.f32.gmra.mxu1 %vm564_vm2, %v6920_v24  ;;  %4572 = vmatprep.mubr.msk.f32.mxu0 %vm564_vm2, %v5141_v31 }
  0xea   : > { %v5867_v2 = vpop.f32.mrf.mxu0  ;;  %4522 = vmatprep.mubr.msk.f32.mxu1 %vm564_vm2, %v6921_v40 }
  0xeb   : > { %v5871_v44 = vpop.f32.mrf.mxu1 }
  0xec   : > { %v5873_v22 = vpop.f32.mrf.mxu0  ;;  %4573 = vmatmul.mubr.msk.f32.gmra.mxu0 %vm564_vm2, %v5144_v32 }
  0xed   : > { %v5877_v6 = vpop.f32.mrf.mxu1  ;;  %4523 = vmatmul.mubr.msk.f32.gmra.mxu1 %vm564_vm2, %v6922_v18  ;;  %4575 = vmatprep.mubr.msk.f32.mxu0 %vm564_vm2, %v5185_v11 }
  0xee   : > { %v5883_v31 = vpop.f32.mrf.mxu0  ;;  %4525 = vmatprep.mubr.msk.f32.mxu1 %vm564_vm2, %v5537_v38 }
  0xef   : > { %v5887_v3 = vpop.f32.mrf.mxu1 }
  0xf0   : > { %v5889_v52 = vpop.f32.mrf.mxu0  ;;  %4576 = vmatmul.mubr.msk.f32.gmra.mxu0 %vm564_vm2, %v6884_v0  ;;  %v2130_v0 = vrot.slane %v5712_v7, 2 }
  0xf1   : > { %v5894_v32 = vpop.f32.mrf.mxu1  ;;  %4526 = vmatmul.mubr.msk.f32.gmra.mxu1 %vm564_vm2, %v5548_v58  ;;  %4578 = vmatprep.mubr.msk.f32.mxu0 %vm564_vm2, %v5229_v51 }
  0xf2   : > { %6923 = vst [vmem:[#allocation37_spill] sm:$0xff] %v5894_v32  ;;  %v5900_v11 = vpop.f32.mrf.mxu0  ;;  %4528 = vmatprep.mubr.msk.f32.mxu1 %vm564_vm2, %v5554_v56  ;;  %v5947_v32 = vld [vmem:[%s5911_s7 + $0x8] sm:$0xff] }
  0xf3   : > { %v5905_v27 = vpop.f32.mrf.mxu1 }
  0xf4   : > { %6924 = vst [vmem:[#allocation38_spill] sm:$0xff] %v5905_v27  ;;  %v5913_v62 = vpop.f32.mrf.mxu0  ;;  %4579 = vmatmul.mubr.msk.f32.gmra.mxu0 %vm564_vm2, %v6885_v16  ;;  %v2132_v27 = vrot.slane %v5722_v29, 2  ;;  %v5934_v16 = vsel %vm1150_vm3, %v2129_v57, %v2130_v0 }
  0xf5   : > { %v5917_v51 = vpop.f32.mrf.mxu1  ;;  %4529 = vmatmul.mubr.msk.f32.gmra.mxu1 %vm564_vm2, %v5565_v63  ;;  %4581 = vmatprep.mubr.msk.f32.mxu0 %vm564_vm2, %v5710_v50  ;;  %6927 = vst [vmem:[#allocation41_spill] sm:$0xff] %v5934_v16 }
  0xf6   : > { %6925 = vst [vmem:[#allocation39_spill] sm:$0xff] %v5917_v51  ;;  %v5923_v41 = vpop.f32.mrf.mxu0  ;;  %4531 = vmatprep.mubr.msk.f32.mxu1 %vm564_vm2, %v5571_v13  ;;  %v5954_v57 = vsel %vm1150_vm3, %v2130_v0, %v2132_v27 }
  0xf7   : > { %v5931_v43 = vpop.f32.mrf.mxu1  ;;  %6929 = vst [vmem:[#allocation43_spill] sm:$0xff] %v5954_v57 }
  0xf8   : > { %6926 = vst [vmem:[#allocation40_spill] sm:$0xff] %v5931_v43  ;;  %v5936_v51 = vpop.f32.mrf.mxu0  ;;  %4582 = vmatmul.mubr.msk.f32.gmra.mxu0 %vm564_vm2, %v5712_v7 }
  0xf9   : > { %v5940_v50 = vpop.f32.mrf.mxu1  ;;  %4532 = vmatmul.mubr.msk.f32.gmra.mxu1 %vm564_vm2, %v5580_v15  ;;  %4584 = vmatprep.mubr.msk.f32.mxu0 %vm564_vm2, %v5928_v36 }
  0xfa   : > { %6928 = vst [vmem:[#allocation42_spill] sm:$0xff] %v5940_v50  ;;  %v5949_v29 = vpop.f32.mrf.mxu0  ;;  %4534 = vmatprep.mubr.msk.f32.mxu1 %vm564_vm2, %v5934_v16 }
  0xfb   : > { %v5956_v43 = vpop.f32.mrf.mxu1 }
  0xfc   : > { %6930 = vst [vmem:[#allocation44_spill] sm:$0xff] %v5956_v43  ;;  %v5958_v7 = vpop.f32.mrf.mxu0  ;;  %4585 = vmatmul.mubr.msk.f32.gmra.mxu0 %vm564_vm2, %v5947_v32 }
  0xfd   : > { %v5962_v50 = vpop.f32.mrf.mxu1  ;;  %4535 = vmatmul.mubr.msk.f32.gmra.mxu1 %vm564_vm2, %v5954_v57  ;;  %4639 = vmatprep.mubr.msk.f32.mxu0 %vm564_vm2, %v5344_v4 }
  0xfe   : > { %6931 = vst [vmem:[#allocation45_spill] sm:$0xff] %v5962_v50  ;;  %v5968_v15 = vpop.f32.mrf.mxu0  ;;  %4589 = vmatprep.mubr.msk.f32.mxu1 %vm564_vm2, %v6889_v14 }
  0xff   : > { %v5972_v27 = vpop.f32.mrf.mxu1 }
 0x100   : > { %6932 = vst [vmem:[#allocation46_spill] sm:$0xff] %v5972_v27  ;;  %v4341_v0 = vpop.f32.mrf.mxu0  ;;  %4640 = vmatmul.mubr.msk.f32.vlgmr.msra.gmra.mxu0 %vm564_vm2, %v5361_v21 }
 0x101   : > { %v4291_v43 = vpop.f32.mrf.mxu1  ;;  %4590 = vmatmul.mubr.msk.f32.vlgmr.msra.gmra.mxu1 %vm564_vm2, %v6890_v17  ;;  %4642 = vmatprep.mubr.msk.f32.mxu0 %vm564_vm2, %v5367_v10 }
 0x102   : > { %v997_v4 = vadd.f32 %v4291_v43, %v5825_v5  ;;  %v1366_v50 = vpop.f32.mrf.mxu0  ;;  %4592 = vmatprep.mubr.msk.f32.mxu1 %vm564_vm2, %v6891_v23 }
 0x103   : > { %v991_v14 = vpop.f32.mrf.mxu1 }
 0x104   : > { %v5983_v57 = vadd.f32 %v4341_v0, %v997_v4  ;;  %v992_v27 = vadd.f32 %v991_v14, %v5835_v20  ;;  %v4344_v16 = vpop.f32.mrf.mxu0  ;;  %4643 = vmatmul.mubr.msk.f32.gmra.mxu0 %vm564_vm2, %v5378_v60  ;;  %v6933_v0 = vld [vmem:[#allocation19_spill] sm:$0xff] }
 0x105   : > { %v4294_v21 = vpop.f32.mrf.mxu1  ;;  %4593 = vmatmul.mubr.msk.f32.gmra.mxu1 %vm564_vm2, %v6892_v9  ;;  %4645 = vmatprep.mubr.msk.f32.mxu0 %vm564_vm2, %v5384_v49 }
 0x106   : > { %v5992_v43 = vadd.f32 %v1366_v50, %v992_v27  ;;  %v1007_v10 = vadd.f32 %v4294_v21, %v5841_v61  ;;  %v1376_v5 = vpop.f32.mrf.mxu0  ;;  %4595 = vmatprep.mubr.msk.f32.mxu1 %vm564_vm2, %v6933_v0 }
 0x107   : > { %v1001_v14 = vpop.f32.mrf.mxu1 }
 0x108   : > { %v5997_v20 = vadd.f32 %v4344_v16, %v1007_v10  ;;  %v1002_v60 = vadd.f32 %v1001_v14, %v5851_v53  ;;  %v4347_v4 = vpop.f32.mrf.mxu0  ;;  %4646 = vmatmul.mubr.msk.f32.gmra.mxu0 %vm564_vm2, %v6912_v33  ;;  %v6934_v16 = vld [vmem:[#allocation24_spill] sm:$0xff]  ;;  %v6935_v14 = vld [vmem:[#allocation27_spill] sm:$0xff] }
 0x109   : > { %v4297_v9 = vpop.f32.mrf.mxu1  ;;  %4596 = vmatmul.mubr.msk.f32.gmra.mxu1 %vm564_vm2, %v6894_v46  ;;  %4648 = vmatprep.mubr.msk.f32.mxu0 %vm564_vm2, %v5401_v12 }
 0x10a   : > { %v6006_v49 = vadd.f32 %v1376_v5, %v1002_v60  ;;  %v1017_v61 = vadd.f32 %v4297_v9, %v5857_v1  ;;  %v1386_v50 = vpop.f32.mrf.mxu0  ;;  %4598 = vmatprep.mubr.msk.f32.mxu1 %vm564_vm2, %v6934_v16  ;;  %v6936_v5 = vld [vmem:[#allocation29_spill] sm:$0xff] }
 0x10b   : > { %v1011_v53 = vpop.f32.mrf.mxu1 }
 0x10c   : > { %v6011_v27 = vadd.f32 %v4347_v4, %v1017_v61  ;;  %v1012_v33 = vadd.f32 %v1011_v53, %v5867_v2  ;;  %v4350_v21 = vpop.f32.mrf.mxu0  ;;  %4649 = vmatmul.mubr.msk.f32.gmra.mxu0 %vm564_vm2, %v6913_v34  ;;  %v6937_v53 = vld [vmem:[#allocation31_spill] sm:$0xff] }
 0x10d   : > { %v4300_v10 = vpop.f32.mrf.mxu1  ;;  %4599 = vmatmul.mubr.msk.f32.gmra.mxu1 %vm564_vm2, %v6935_v14  ;;  %4651 = vmatprep.mubr.msk.f32.mxu0 %vm564_vm2, %v5418_v37 }
 0x10e   : > { %v6020_v12 = vadd.f32 %v1386_v50, %v1012_v33  ;;  %v1027_v9 = vadd.f32 %v4300_v10, %v5873_v22  ;;  %v1396_v1 = vpop.f32.mrf.mxu0  ;;  %4601 = vmatprep.mubr.msk.f32.mxu1 %vm564_vm2, %v6936_v5  ;;  %v6938_v33 = vld [vmem:[#allocation33_spill] sm:$0xff] }
 0x10f   : > { %v1021_v2 = vpop.f32.mrf.mxu1 }
 0x110   : > { %v6025_v60 = vadd.f32 %v4350_v21, %v1027_v9  ;;  %v1022_v34 = vadd.f32 %v1021_v2, %v5883_v31  ;;  %v4353_v4 = vpop.f32.mrf.mxu0  ;;  %4652 = vmatmul.mubr.msk.f32.gmra.mxu0 %vm564_vm2, %v6914_v47  ;;  %v6939_v2 = vld [vmem:[#allocation35_spill] sm:$0xff] }
 0x111   : > { %v4303_v61 = vpop.f32.mrf.mxu1  ;;  %4602 = vmatmul.mubr.msk.f32.gmra.mxu1 %vm564_vm2, %v6937_v53  ;;  %4654 = vmatprep.mubr.msk.f32.mxu0 %vm564_vm2, %v5435_v28 }
 0x112   : > { %v6034_v37 = vadd.f32 %v1396_v1, %v1022_v34  ;;  %v1037_v22 = vadd.f32 %v4303_v61, %v5889_v52  ;;  %v1406_v50 = vpop.f32.mrf.mxu0  ;;  %4604 = vmatprep.mubr.msk.f32.mxu1 %vm564_vm2, %v6938_v33  ;;  %v6940_v34 = vld [vmem:[#allocation5_spill] sm:$0xff] }
 0x113   : > { %v1031_v31 = vpop.f32.mrf.mxu1 }
 0x114   : > { %v6039_v21 = vadd.f32 %v4353_v4, %v1037_v22  ;;  %v1032_v47 = vadd.f32 %v1031_v31, %v5900_v11  ;;  %v4356_v10 = vpop.f32.mrf.mxu0  ;;  %4655 = vmatmul.mubr.msk.f32.gmra.mxu0 %vm564_vm2, %v6915_v48  ;;  %v6941_v31 = vld [vmem:[#allocation6_spill] sm:$0xff] }
 0x115   : > { %v4306_v9 = vpop.f32.mrf.mxu1  ;;  %4605 = vmatmul.mubr.msk.f32.gmra.mxu1 %vm564_vm2, %v6939_v2  ;;  %4657 = vmatprep.mubr.msk.f32.mxu0 %vm564_vm2, %v5452_v45 }
 0x116   : > { %v6048_v28 = vadd.f32 %v1406_v50, %v1032_v47  ;;  %v1047_v52 = vadd.f32 %v4306_v9, %v5913_v62  ;;  %v1416_v1 = vpop.f32.mrf.mxu0  ;;  %4607 = vmatprep.mubr.msk.f32.mxu1 %vm564_vm2, %v6940_v34  ;;  %v6942_v47 = vld [vmem:[#allocation8_spill] sm:$0xff] }
 0x117   : > { %v1041_v11 = vpop.f32.mrf.mxu1 }
 0x118   : > { %v6053_v4 = vadd.f32 %v4356_v10, %v1047_v52  ;;  %v1042_v48 = vadd.f32 %v1041_v11, %v5923_v41  ;;  %v4359_v61 = vpop.f32.mrf.mxu0  ;;  %4658 = vmatmul.mubr.msk.f32.gmra.mxu0 %vm564_vm2, %v6916_v55  ;;  %v6943_v11 = vld [vmem:[#allocation10_spill] sm:$0xff] }
 0x119   : > { %v4309_v22 = vpop.f32.mrf.mxu1  ;;  %4608 = vmatmul.mubr.msk.f32.gmra.mxu1 %vm564_vm2, %v6941_v31  ;;  %4660 = vmatprep.mubr.msk.f32.mxu0 %vm564_vm2, %v5469_v26 }
 0x11a   : > { %v6062_v62 = vadd.f32 %v1416_v1, %v1042_v48  ;;  %v1057_v45 = vadd.f32 %v4309_v22, %v5936_v51  ;;  %v1426_v50 = vpop.f32.mrf.mxu0  ;;  %4610 = vmatprep.mubr.msk.f32.mxu1 %vm564_vm2, %v6942_v47  ;;  %v6944_v48 = vld [vmem:[#allocation12_spill] sm:$0xff] }
 0x11b   : > { %v1051_v41 = vpop.f32.mrf.mxu1 }
 0x11c   : > { %v6067_v10 = vadd.f32 %v4359_v61, %v1057_v45  ;;  %v1052_v55 = vadd.f32 %v1051_v41, %v5949_v29  ;;  %v4362_v9 = vpop.f32.mrf.mxu0  ;;  %4661 = vmatmul.mubr.msk.f32.gmra.mxu0 %vm564_vm2, %v6917_v19  ;;  %v6945_v41 = vld [vmem:[#allocation14_spill] sm:$0xff] }
 0x11d   : > { %v4312_v52 = vpop.f32.mrf.mxu1  ;;  %4611 = vmatmul.mubr.msk.f32.gmra.mxu1 %vm564_vm2, %v6943_v11  ;;  %4663 = vmatprep.mubr.msk.f32.mxu0 %vm564_vm2, %v5486_v42 }
 0x11e   : > { %v6076_v26 = vadd.f32 %v1426_v50, %v1052_v55  ;;  %v1067_v51 = vadd.f32 %v4312_v52, %v5958_v7  ;;  %v1436_v1 = vpop.f32.mrf.mxu0  ;;  %4613 = vmatprep.mubr.msk.f32.mxu1 %vm564_vm2, %v6944_v48  ;;  %v6946_v55 = vld [vmem:[#allocation16_spill] sm:$0xff] }
 0x11f   : > { %v1061_v29 = vpop.f32.mrf.mxu1 }
 0x120   : > { %v6081_v61 = vadd.f32 %v4362_v9, %v1067_v51  ;;  %v1062_v19 = vadd.f32 %v1061_v29, %v5968_v15  ;;  %v4365_v22 = vpop.f32.mrf.mxu0  ;;  %4664 = vmatmul.mubr.msk.f32.gmra.mxu0 %vm564_vm2, %v6918_v25  ;;  %v6947_v29 = vld [vmem:[#allocation18_spill] sm:$0xff] }
 0x121   : > { %v4315_v45 = vpop.f32.mrf.mxu1  ;;  %4614 = vmatmul.mubr.msk.f32.gmra.mxu1 %vm564_vm2, %v6945_v41  ;;  %4666 = vmatprep.mubr.msk.f32.mxu0 %vm564_vm2, %v6919_v30 }
 0x122   : > { %v6090_v42 = vadd.f32 %v1436_v1, %v1062_v19  ;;  %v1077_v7 = vadd.f32 %v4315_v45, %v5829_v8  ;;  %v1446_v50 = vpop.f32.mrf.mxu0  ;;  %4616 = vmatprep.mubr.msk.f32.mxu1 %vm564_vm2, %v6946_v55  ;;  %v6948_v19 = vld [vmem:[#allocation20_spill] sm:$0xff] }
 0x123   : > { %v1071_v15 = vpop.f32.mrf.mxu1 }
 0x124   : > { %v6095_v9 = vadd.f32 %v4365_v22, %v1077_v7  ;;  %v1072_v25 = vadd.f32 %v1071_v15, %v5839_v35  ;;  %v4368_v52 = vpop.f32.mrf.mxu0  ;;  %4667 = vmatmul.mubr.msk.f32.gmra.mxu0 %vm564_vm2, %v6920_v24  ;;  %v6949_v15 = vld [vmem:[#allocation23_spill] sm:$0xff] }
 0x125   : > { %v4318_v51 = vpop.f32.mrf.mxu1  ;;  %4617 = vmatmul.mubr.msk.f32.gmra.mxu1 %vm564_vm2, %v6947_v29  ;;  %4669 = vmatprep.mubr.msk.f32.mxu0 %vm564_vm2, %v6921_v40 }
 0x126   : > { %v6104_v8 = vadd.f32 %v1446_v50, %v1072_v25  ;;  %v1087_v30 = vadd.f32 %v4318_v51, %v5845_v39  ;;  %v1456_v1 = vpop.f32.mrf.mxu0  ;;  %4619 = vmatprep.mubr.msk.f32.mxu1 %vm564_vm2, %v6948_v19  ;;  %v6950_v25 = vld [vmem:[#allocation25_spill] sm:$0xff]  ;;  %v6961_v19 = vld [vmem:[#allocation26_spill] sm:$0xff] }
 0x127   : > { %v1081_v35 = vpop.f32.mrf.mxu1 }
 0x128   : > { %v6109_v22 = vadd.f32 %v4368_v52, %v1087_v30  ;;  %v1082_v24 = vadd.f32 %v1081_v35, %v5855_v59  ;;  %v4371_v45 = vpop.f32.mrf.mxu0  ;;  %4670 = vmatmul.mubr.msk.f32.gmra.mxu0 %vm564_vm2, %v6922_v18  ;;  %v6951_v35 = vld [vmem:[#allocation28_spill] sm:$0xff] }
 0x129   : > { %v4321_v7 = vpop.f32.mrf.mxu1  ;;  %4620 = vmatmul.mubr.msk.f32.gmra.mxu1 %vm564_vm2, %v6949_v15  ;;  %4672 = vmatprep.mubr.msk.f32.mxu0 %vm564_vm2, %v5537_v38  ;;  %v6957_v15 = vld [vmem:[#allocation21_spill] sm:$0xff] }
 0x12a   : > { %v6118_v39 = vadd.f32 %v1456_v1, %v1082_v24  ;;  %v1097_v40 = vadd.f32 %v4321_v7, %v5861_v54  ;;  %v1466_v50 = vpop.f32.mrf.mxu0  ;;  %4622 = vmatprep.mubr.msk.f32.mxu1 %vm564_vm2, %v6950_v25  ;;  %v6952_v24 = vld [vmem:[#allocation30_spill] sm:$0xff] }
 0x12b   : > { %v1091_v59 = vpop.f32.mrf.mxu1 }
 0x12c   : > { %v6123_v52 = vadd.f32 %v4371_v45, %v1097_v40  ;;  %v1092_v18 = vadd.f32 %v1091_v59, %v5871_v44  ;;  %v4374_v51 = vpop.f32.mrf.mxu0  ;;  %4673 = vmatmul.mubr.msk.f32.gmra.mxu0 %vm564_vm2, %v5548_v58 }
 0x12d   : > { %v4324_v30 = vpop.f32.mrf.mxu1  ;;  %4623 = vmatmul.mubr.msk.f32.gmra.mxu1 %vm564_vm2, %v6951_v35  ;;  %4675 = vmatprep.mubr.msk.f32.mxu0 %vm564_vm2, %v5554_v56  ;;  %v6953_v56 = vld [vmem:[#allocation32_spill] sm:$0xff] }
 0x12e   : > { %v6132_v38 = vadd.f32 %v1466_v50, %v1092_v18  ;;  %v1107_v54 = vadd.f32 %v4324_v30, %v5877_v6  ;;  %v1476_v1 = vpop.f32.mrf.mxu0  ;;  %4625 = vmatprep.mubr.msk.f32.mxu1 %vm564_vm2, %v6952_v24  ;;  %v2940_v6 = vrot.slane %v5928_v36, 2  ;;  %v2941_v50 = vrot.slane %v5947_v32, 2  ;;  %v6954_v18 = vld [vmem:[#allocation37_spill] sm:$0xff]  ;;  %v6955_v30 = vld [vmem:[#allocation34_spill] sm:$0xff] }
 0x12f   : > { %v1101_v44 = vpop.f32.mrf.mxu1 }
 0x130   : > { %v6137_v45 = vadd.f32 %v4374_v51, %v1107_v54  ;;  %v1102_v58 = vadd.f32 %v1101_v44, %v5887_v3  ;;  %v4377_v7 = vpop.f32.mrf.mxu0  ;;  %4676 = vmatmul.mubr.msk.f32.gmra.mxu0 %vm564_vm2, %v5565_v63  ;;  %v431_v63 = vld [vmem:[%s5911_s7 + $0x10] sm:$0x3]  ;;  %v2669_v54 = vrot.slane %v5928_v36, 1  ;;  %v2670_v44 = vrot.slane %v5947_v32, 1  ;;  %s4756_s7 = scalar_lea.vmem %s4755_s29, 8192 }
 0x131   : > { %v4327_v40 = vpop.f32.mrf.mxu1  ;;  %4626 = vmatmul.mubr.msk.f32.gmra.mxu1 %vm564_vm2, %v6953_v56  ;;  %4678 = vmatprep.mubr.msk.f32.mxu0 %vm564_vm2, %v5571_v13  ;;  %v6956_v13 = vld [vmem:[#allocation38_spill] sm:$0xff]  ;;  %v2672_v36 = vrot.slane %v431_v63, 1  ;;  %v6960_v32 = vld [vmem:[#allocation39_spill] sm:$0xff]  ;;  %p4758_p2 = scmp.lt.s32.totalorder %s4756_s7, %s4750_s27 }
 0x132   : > { %v6148_v59 = vadd.f32 %v1476_v1, %v1102_v58  ;;  %v1117_v51 = vadd.f32 %v4327_v40, %v6954_v18  ;;  %v1486_v3 = vpop.f32.mrf.mxu0  ;;  %4628 = vmatprep.mubr.msk.f32.mxu1 %vm564_vm2, %v6955_v30  ;;  %v2943_v1 = vrot.slane %v431_v63, 2  ;;  %v6958_v40 = vld [vmem:[#allocation36_spill] sm:$0xff]  ;;  %v6959_v18 = vld [vmem:[#allocation41_spill] sm:$0xff] }
 0x133   : > { %v1111_v56 = vpop.f32.mrf.mxu1  ;;  %p4759_p3 = por %p4758_p2, %p4757_p1 }
 0x134   : > { %v6156_v24 = vadd.f32 %v4377_v7, %v1117_v51  ;;  %v1112_v35 = vadd.f32 %v1111_v56, %v6956_v13  ;;  %v4380_v25 = vpop.f32.mrf.mxu0  ;;  %4679 = vmatmul.mubr.msk.f32.gmra.mxu0 %vm564_vm2, %v6957_v15  ;;  %v2942_v56 = vsel %vm1150_vm3, %v2940_v6, %v2941_v50  ;;  %v2671_v13 = vsel %vm481_vm1, %v2669_v54, %v2670_v44 }
 0x135   : > { %v4330_v58 = vpop.f32.mrf.mxu1  ;;  %4629 = vmatmul.mubr.msk.f32.gmra.mxu1 %vm564_vm2, %v6958_v40  ;;  %4681 = vmatprep.mubr.msk.f32.mxu0 %vm564_vm2, %v6959_v18  ;;  %v6962_v40 = vld [vmem:[#allocation40_spill] sm:$0xff]  ;;  %v6963_v18 = vld [vmem:[#allocation43_spill] sm:$0xff]  ;;  %v2944_v63 = vsel %vm1150_vm3, %v2941_v50, %v2943_v1  ;;  %v6967_v50 = vld [vmem:[#allocation45_spill] sm:$0xff]  ;;  %p4760_p5 = pnand %p4759_p3, %p4753_p0 }
 0x136   : > { %v6165_v30 = vadd.f32 %v1486_v3, %v1112_v35  ;;  %v1127_v7 = vadd.f32 %v4330_v58, %v6960_v32  ;;  %v1496_v51 = vpop.f32.mrf.mxu0  ;;  %4631 = vmatprep.mubr.msk.f32.mxu1 %vm564_vm2, %v6961_v19  ;;  %v6964_v3 = vld [vmem:[#allocation48_spill] sm:$0xff]  ;;  %v6965_v58 = vld [vmem:[#allocation42_spill] sm:$0xff] }
 0x137   : > { %v1121_v15 = vpop.f32.mrf.mxu1 }
 0x138   : > { %v6172_v29 = vadd.f32 %v4380_v25, %v1127_v7  ;;  %v1122_v55 = vadd.f32 %v1121_v15, %v6962_v40  ;;  %v4383_v41 = vpop.f32.mrf.mxu0  ;;  %4682 = vmatmul.mubr.msk.f32.gmra.mxu0 %vm564_vm2, %v6963_v18  ;;  %v2673_v40 = vsel %vm481_vm1, %v2670_v44, %v2672_v36  ;;  %v6966_v15 = vld [vmem:[#allocation44_spill] sm:$0xff]  ;;  %v6968_v44 = vld [vmem:[#allocation46_spill] sm:$0xff] }
 0x139   : > { %v4333_v35 = vpop.f32.mrf.mxu1  ;;  %4632 = vmatmul.mubr.msk.f32.gmra.mxu1 %vm564_vm2, %v6964_v3  ;;  %4684 = vmatprep.mubr.msk.f32.mxu0 %vm564_vm2, %v2942_v56 }
 0x13a   : > { %v6181_v6 = vadd.f32 %v1496_v51, %v1122_v55  ;;  %v1137_v54 = vadd.f32 %v4333_v35, %v6965_v58  ;;  %v1506_v25 = vpop.f32.mrf.mxu0  ;;  %4634 = vmatprep.mubr.msk.f32.mxu1 %vm564_vm2, %v2671_v13 }
 0x13b   : > { %v1131_v32 = vpop.f32.mrf.mxu1 }
 0x13c   : > { %v6186_v7 = vadd.f32 %v4383_v41, %v1137_v54  ;;  %v1132_v18 = vadd.f32 %v1131_v32, %v6966_v15  ;;  %v4386_v19 = vpop.f32.mrf.mxu0  ;;  %4685 = vmatmul.mubr.msk.f32.gmra.mxu0 %vm564_vm2, %v2944_v63 }
 0x13d   : > { %v4336_v56 = vpop.f32.mrf.mxu1  ;;  %4635 = vmatmul.mubr.msk.f32.gmra.mxu1 %vm564_vm2, %v2673_v40 }
 0x13e   : > { %v6191_v55 = vadd.f32 %v1506_v25, %v1132_v18  ;;  %v1147_v1 = vadd.f32 %v4336_v56, %v6967_v50  ;;  %v1516_v51 = vpop.f32.mrf.mxu0 }
 0x13f   : > { %v1141_v35 = vpop.f32.mrf.mxu1 }
 0x140   : > { %v6194_v13 = vadd.f32 %v4386_v19, %v1147_v1  ;;  %v1142_v36 = vadd.f32 %v1141_v35, %v6968_v44  ;;  %v4441_v41 = vpop.f32.mrf.mxu0 }
 0x141   : > { %v4391_v58 = vpop.f32.mrf.mxu1 }
 0x142   : > { %v6197_v54 = vadd.f32 %v1516_v51, %v1142_v36  ;;  %v1794_v32 = vadd.f32 %v4391_v58, %v5983_v57  ;;  %v1938_v63 = vpop.f32.mrf.mxu0 }
 0x143   : > { %v1634_v15 = vpop.f32.mrf.mxu1 }
 0x144   : > { %v6200_v3 = vadd.f32 %v4441_v41, %v1794_v32  ;;  %v1793_v25 = vadd.f32 %v1634_v15, %v5992_v43  ;;  %v4444_v40 = vpop.f32.mrf.mxu0 }
 0x145   : > { %v4394_v18 = vpop.f32.mrf.mxu1 }
 0x146   : > { %v6203_v56 = vadd.f32 %v1938_v63, %v1793_v25  ;;  %v1796_v19 = vadd.f32 %v4394_v18, %v5997_v20  ;;  %v1948_v50 = vpop.f32.mrf.mxu0 }
 0x147   : > { %v1644_v1 = vpop.f32.mrf.mxu1 }
 0x148   : > { %v6206_v35 = vadd.f32 %v4444_v40, %v1796_v19  ;;  %v1795_v51 = vadd.f32 %v1644_v1, %v6006_v49  ;;  %v4447_v44 = vpop.f32.mrf.mxu0 }
 0x149   : > { %v4397_v57 = vpop.f32.mrf.mxu1 }
 0x14a   : > { %v6209_v36 = vadd.f32 %v1948_v50, %v1795_v51  ;;  %v1798_v41 = vadd.f32 %v4397_v57, %v6011_v27  ;;  %v1958_v58 = vpop.f32.mrf.mxu0 }
 0x14b   : > { %v1654_v43 = vpop.f32.mrf.mxu1 }
 0x14c   : > { %v6212_v32 = vadd.f32 %v4447_v44, %v1798_v41  ;;  %v1797_v63 = vadd.f32 %v1654_v43, %v6020_v12  ;;  %v4450_v15 = vpop.f32.mrf.mxu0 }
 0x14d   : > { %v4400_v20 = vpop.f32.mrf.mxu1 }
 0x14e   : > { %v6215_v25 = vadd.f32 %v1958_v58, %v1797_v63  ;;  %v1800_v40 = vadd.f32 %v4400_v20, %v6025_v60  ;;  %v1968_v18 = vpop.f32.mrf.mxu0 }
 0x14f   : > { %v1664_v49 = vpop.f32.mrf.mxu1 }
 0x150   : > { %v6218_v19 = vadd.f32 %v4450_v15, %v1800_v40  ;;  %v1799_v50 = vadd.f32 %v1664_v49, %v6034_v37  ;;  %v4453_v1 = vpop.f32.mrf.mxu0 }
 0x151   : > { %v4403_v27 = vpop.f32.mrf.mxu1 }
 0x152   : > { %v6221_v51 = vadd.f32 %v1968_v18, %v1799_v50  ;;  %v1802_v44 = vadd.f32 %v4403_v27, %v6039_v21  ;;  %v1978_v57 = vpop.f32.mrf.mxu0 }
 0x153   : > { %v1674_v12 = vpop.f32.mrf.mxu1 }
 0x154   : > { %v6224_v41 = vadd.f32 %v4453_v1, %v1802_v44  ;;  %v1801_v58 = vadd.f32 %v1674_v12, %v6048_v28  ;;  %v4456_v43 = vpop.f32.mrf.mxu0 }
 0x155   : > { %v4406_v60 = vpop.f32.mrf.mxu1 }
 0x156   : > { %v6227_v63 = vadd.f32 %v1978_v57, %v1801_v58  ;;  %v1804_v15 = vadd.f32 %v4406_v60, %v6053_v4  ;;  %v1988_v20 = vpop.f32.mrf.mxu0 }
 0x157   : > { %v1684_v37 = vpop.f32.mrf.mxu1 }
 0x158   : > { %v6230_v40 = vadd.f32 %v4456_v43, %v1804_v15  ;;  %v1803_v18 = vadd.f32 %v1684_v37, %v6062_v62  ;;  %v4459_v49 = vpop.f32.mrf.mxu0 }
 0x159   : > { %v4409_v21 = vpop.f32.mrf.mxu1 }
 0x15a   : > { %v6233_v50 = vadd.f32 %v1988_v20, %v1803_v18  ;;  %v1806_v1 = vadd.f32 %v4409_v21, %v6067_v10  ;;  %v1998_v27 = vpop.f32.mrf.mxu0 }
 0x15b   : > { %v1694_v28 = vpop.f32.mrf.mxu1 }
 0x15c   : > { %v6236_v44 = vadd.f32 %v4459_v49, %v1806_v1  ;;  %v1805_v57 = vadd.f32 %v1694_v28, %v6076_v26  ;;  %v4462_v12 = vpop.f32.mrf.mxu0 }
 0x15d   : > { %v4412_v4 = vpop.f32.mrf.mxu1 }
 0x15e   : > { %v6239_v58 = vadd.f32 %v1998_v27, %v1805_v57  ;;  %v1808_v43 = vadd.f32 %v4412_v4, %v6081_v61  ;;  %v2008_v60 = vpop.f32.mrf.mxu0 }
 0x15f   : > { %v1704_v62 = vpop.f32.mrf.mxu1 }
 0x160   : > { %v6242_v15 = vadd.f32 %v4462_v12, %v1808_v43  ;;  %v1807_v20 = vadd.f32 %v1704_v62, %v6090_v42  ;;  %v4465_v37 = vpop.f32.mrf.mxu0 }
 0x161   : > { %v4415_v10 = vpop.f32.mrf.mxu1 }
 0x162   : > { %v6245_v18 = vadd.f32 %v2008_v60, %v1807_v20  ;;  %v1810_v49 = vadd.f32 %v4415_v10, %v6095_v9  ;;  %v2018_v21 = vpop.f32.mrf.mxu0 }
 0x163   : > { %v1714_v26 = vpop.f32.mrf.mxu1 }
 0x164   : > { %v6248_v1 = vadd.f32 %v4465_v37, %v1810_v49  ;;  %v1809_v27 = vadd.f32 %v1714_v26, %v6104_v8  ;;  %v4468_v28 = vpop.f32.mrf.mxu0 }
 0x165   : > { %v4418_v61 = vpop.f32.mrf.mxu1 }
 0x166   : > { %v6251_v57 = vadd.f32 %v2018_v21, %v1809_v27  ;;  %v1812_v12 = vadd.f32 %v4418_v61, %v6109_v22  ;;  %v2028_v4 = vpop.f32.mrf.mxu0 }
 0x167   : > { %v1724_v42 = vpop.f32.mrf.mxu1 }
 0x168   : > { %v6254_v43 = vadd.f32 %v4468_v28, %v1812_v12  ;;  %v1811_v60 = vadd.f32 %v1724_v42, %v6118_v39  ;;  %v4471_v62 = vpop.f32.mrf.mxu0 }
 0x169   : > { %v4421_v9 = vpop.f32.mrf.mxu1 }
 0x16a   : > { %v6257_v20 = vadd.f32 %v2028_v4, %v1811_v60  ;;  %v1814_v37 = vadd.f32 %v4421_v9, %v6123_v52  ;;  %v2038_v10 = vpop.f32.mrf.mxu0 }
 0x16b   : > { %v1734_v8 = vpop.f32.mrf.mxu1 }
 0x16c   : > { %v6260_v49 = vadd.f32 %v4471_v62, %v1814_v37  ;;  %v1813_v21 = vadd.f32 %v1734_v8, %v6132_v38  ;;  %v4474_v26 = vpop.f32.mrf.mxu0 }
 0x16d   : > { %v4424_v22 = vpop.f32.mrf.mxu1 }
 0x16e   : > { %v6263_v27 = vadd.f32 %v2038_v10, %v1813_v21  ;;  %v1816_v28 = vadd.f32 %v4424_v22, %v6137_v45  ;;  %v2048_v61 = vpop.f32.mrf.mxu0 }
 0x16f   : > { %v1744_v39 = vpop.f32.mrf.mxu1 }
 0x170   : > { %v6266_v12 = vadd.f32 %v4474_v26, %v1816_v28  ;;  %v1815_v4 = vadd.f32 %v1744_v39, %v6148_v59  ;;  %v4477_v42 = vpop.f32.mrf.mxu0 }
 0x171   : > { %v4427_v52 = vpop.f32.mrf.mxu1 }
 0x172   : > { %v6269_v60 = vadd.f32 %v2048_v61, %v1815_v4  ;;  %v1818_v62 = vadd.f32 %v4427_v52, %v6156_v24  ;;  %v2058_v9 = vpop.f32.mrf.mxu0 }
 0x173   : > { %v1754_v38 = vpop.f32.mrf.mxu1 }
 0x174   : > { %6969 = vst [vmem:[#allocation47_spill] sm:$0xff] %v6269_v60  ;;  %v6272_v37 = vadd.f32 %v4477_v42, %v1818_v62  ;;  %v1817_v10 = vadd.f32 %v1754_v38, %v6165_v30  ;;  %v4480_v8 = vpop.f32.mrf.mxu0 }
 0x175   : > { %v4430_v45 = vpop.f32.mrf.mxu1 }
 0x176   : > { %v6275_v21 = vadd.f32 %v2058_v9, %v1817_v10  ;;  %v1820_v26 = vadd.f32 %v4430_v45, %v6172_v29  ;;  %v2068_v22 = vpop.f32.mrf.mxu0 }
 0x177   : > { %v1764_v59 = vpop.f32.mrf.mxu1 }
 0x178   : > { %6970 = vst [vmem:[#allocation37_spill] sm:$0xff] %v6275_v21  ;;  %v6278_v28 = vadd.f32 %v4480_v8, %v1820_v26  ;;  %v1819_v61 = vadd.f32 %v1764_v59, %v6181_v6  ;;  %v4483_v39 = vpop.f32.mrf.mxu0 }
 0x179   : > { %v4433_v24 = vpop.f32.mrf.mxu1 }
 0x17a   : > { %v6281_v4 = vadd.f32 %v2068_v22, %v1819_v61  ;;  %v1822_v42 = vadd.f32 %v4433_v24, %v6186_v7  ;;  %v2078_v52 = vpop.f32.mrf.mxu0 }
 0x17b   : > { %v1774_v30 = vpop.f32.mrf.mxu1 }
 0x17c   : > { %6971 = vst [vmem:[#allocation38_spill] sm:$0xff] %v6281_v4  ;;  %v6284_v62 = vadd.f32 %v4483_v39, %v1822_v42  ;;  %v1821_v9 = vadd.f32 %v1774_v30, %v6191_v55  ;;  %v4486_v38 = vpop.f32.mrf.mxu0 }
 0x17d   : > { %v4436_v29 = vpop.f32.mrf.mxu1 }
 0x17e   : > { %v6287_v10 = vadd.f32 %v2078_v52, %v1821_v9  ;;  %v1824_v8 = vadd.f32 %v4436_v29, %v6194_v13  ;;  %v2088_v45 = vpop.f32.mrf.mxu0 }
 0x17f   : > { %v1784_v6 = vpop.f32.mrf.mxu1 }
 0x180   : > { %6972 = vst [vmem:[#allocation21_spill] sm:$0xff] %v6287_v10  ;;  %v6290_v26 = vadd.f32 %v4486_v38, %v1824_v8  ;;  %v1823_v22 = vadd.f32 %v1784_v6, %v6197_v54  ;;  %v6293_v59 = vpop.f32.mrf.mxu0 }
 0x181   : > { %v6295_v7 = vpop.f32.mrf.mxu1 }
 0x182   : > { %v6297_v61 = vadd.f32 %v2088_v45, %v1823_v22  ;;  %v6299_v39 = vpop.f32.mrf.mxu0 }
 0x183   : > { %v6301_v55 = vpop.f32.mrf.mxu1 }
 0x184   : > { %6973 = vst [vmem:[#allocation41_spill] sm:$0xff] %v6297_v61  ;;  %v6303_v24 = vpop.f32.mrf.mxu0 }
 0x185   : > { %v6305_v42 = vpop.f32.mrf.mxu1 }
 0x186   : > { %v6307_v13 = vpop.f32.mrf.mxu0 }
 0x187   : > { %v6309_v52 = vpop.f32.mrf.mxu1 }
 0x188   : > { %v4547_v30 = vpop.f32.mrf.mxu0 }
 0x189   : > { %v4497_v54 = vpop.f32.mrf.mxu1 }
 0x18a   : > { %v2373_v9 = vadd.f32 %v4497_v54, %v6212_v32  ;;  %v6312_v38 = vpop.f32.mrf.mxu0 }
 0x18b   : > { %v6314_v29 = vpop.f32.mrf.mxu1 }
 0x18c   : > { %v6316_v8 = vadd.f32 %v4547_v30, %v2373_v9  ;;  %v4550_v45 = vpop.f32.mrf.mxu0 }
 0x18d   : > { %v4500_v6 = vpop.f32.mrf.mxu1 }
 0x18e   : > { %v2375_v22 = vadd.f32 %v4500_v6, %v6218_v19  ;;  %v6319_v48 = vpop.f32.mrf.mxu0 }
 0x18f   : > { %v6321_v11 = vpop.f32.mrf.mxu1 }
 0x190   : > { %v6323_v47 = vadd.f32 %v4550_v45, %v2375_v22  ;;  %v4553_v31 = vpop.f32.mrf.mxu0 }
 0x191   : > { %v4503_v34 = vpop.f32.mrf.mxu1 }
 0x192   : > { %v2377_v32 = vadd.f32 %v4503_v34, %v6224_v41  ;;  %v6326_v54 = vpop.f32.mrf.mxu0 }
 0x193   : > { %v6328_v2 = vpop.f32.mrf.mxu1 }
 0x194   : > { %v6330_v30 = vadd.f32 %v4553_v31, %v2377_v32  ;;  %v4556_v9 = vpop.f32.mrf.mxu0 }
 0x195   : > { %v4506_v33 = vpop.f32.mrf.mxu1 }
 0x196   : > { %v2379_v19 = vadd.f32 %v4506_v33, %v6230_v40  ;;  %v6333_v6 = vpop.f32.mrf.mxu0 }
 0x197   : > { %v6335_v53 = vpop.f32.mrf.mxu1 }
 0x198   : > { %v6337_v45 = vadd.f32 %v4556_v9, %v2379_v19  ;;  %v4559_v22 = vpop.f32.mrf.mxu0 }
 0x199   : > { %v4509_v5 = vpop.f32.mrf.mxu1 }
 0x19a   : > { %v2381_v34 = vadd.f32 %v4509_v5, %v6236_v44  ;;  %v6340_v41 = vpop.f32.mrf.mxu0 }
 0x19b   : > { %v6342_v14 = vpop.f32.mrf.mxu1 }
 0x19c   : > { %v6344_v31 = vadd.f32 %v4559_v22, %v2381_v34  ;;  %v4562_v32 = vpop.f32.mrf.mxu0 }
 0x19d   : > { %v4512_v16 = vpop.f32.mrf.mxu1 }
 0x19e   : > { %v2383_v33 = vadd.f32 %v4512_v16, %v6242_v15  ;;  %v6347_v40 = vpop.f32.mrf.mxu0 }
 0x19f   : > { %v6349_v46 = vpop.f32.mrf.mxu1 }
 0x1a0   : > { %v6351_v9 = vadd.f32 %v4562_v32, %v2383_v33  ;;  %v4565_v19 = vpop.f32.mrf.mxu0 }
 0x1a1   : > { %v4515_v0 = vpop.f32.mrf.mxu1 }
 0x1a2   : > { %v2385_v5 = vadd.f32 %v4515_v0, %v6248_v1  ;;  %v6354_v44 = vpop.f32.mrf.mxu0 }
 0x1a3   : > { %v6356_v23 = vpop.f32.mrf.mxu1 }
 0x1a4   : > { %v6358_v22 = vadd.f32 %v4565_v19, %v2385_v5  ;;  %v4568_v34 = vpop.f32.mrf.mxu0 }
 0x1a5   : > { %v4518_v17 = vpop.f32.mrf.mxu1 }
 0x1a6   : > { %v2387_v16 = vadd.f32 %v4518_v17, %v6254_v43  ;;  %v6361_v15 = vpop.f32.mrf.mxu0 }
 0x1a7   : > { %v6363_v61 = vpop.f32.mrf.mxu1 }
 0x1a8   : > { %v6365_v32 = vadd.f32 %v4568_v34, %v2387_v16  ;;  %v4571_v33 = vpop.f32.mrf.mxu0 }
 0x1a9   : > { %v4521_v10 = vpop.f32.mrf.mxu1 }
 0x1aa   : > { %6974 = vst [vmem:[#allocation39_spill] sm:$0xff] %v6365_v32  ;;  %v2389_v0 = vadd.f32 %v4521_v10, %v6260_v49  ;;  %v6368_v1 = vpop.f32.mrf.mxu0 }
 0x1ab   : > { %6975 = vst [vmem:[#allocation40_spill] sm:$0xff] %v6368_v1  ;;  %v6370_v4 = vpop.f32.mrf.mxu1 }
 0x1ac   : > { %v6372_v19 = vadd.f32 %v4571_v33, %v2389_v0  ;;  %v4574_v5 = vpop.f32.mrf.mxu0 }
 0x1ad   : > { %v4524_v21 = vpop.f32.mrf.mxu1 }
 0x1ae   : > { %6976 = vst [vmem:[#allocation43_spill] sm:$0xff] %v6372_v19  ;;  %v2391_v17 = vadd.f32 %v4524_v21, %v6266_v12  ;;  %v6375_v43 = vpop.f32.mrf.mxu0 }
 0x1af   : > { %6977 = vst [vmem:[#allocation42_spill] sm:$0xff] %v6375_v43  ;;  %v6377_v60 = vpop.f32.mrf.mxu1 }
 0x1b0   : > { %v6379_v34 = vadd.f32 %v4574_v5, %v2391_v17  ;;  %v4577_v16 = vpop.f32.mrf.mxu0 }
 0x1b1   : > { %v4527_v32 = vpop.f32.mrf.mxu1 }
 0x1b2   : > { %6978 = vst [vmem:[#allocation44_spill] sm:$0xff] %v6379_v34  ;;  %v2393_v49 = vadd.f32 %v4527_v32, %v6272_v37  ;;  %v6382_v10 = vpop.f32.mrf.mxu0 }
 0x1b3   : > { %6979 = vst [vmem:[#allocation45_spill] sm:$0xff] %v6382_v10  ;;  %v6384_v1 = vpop.f32.mrf.mxu1 }
 0x1b4   : > { %v6386_v33 = vadd.f32 %v4577_v16, %v2393_v49  ;;  %v4580_v0 = vpop.f32.mrf.mxu0  ;;  %v2369_v16 = vadd.f32 %v6295_v7, %v6200_v3 }
 0x1b5   : > { %v4530_v19 = vpop.f32.mrf.mxu1 }
 0x1b6   : > { %v2395_v12 = vadd.f32 %v4530_v19, %v6278_v28  ;;  %v6389_v21 = vpop.f32.mrf.mxu0 }
 0x1b7   : > { %6980 = vst [vmem:[#allocation46_spill] sm:$0xff] %v6389_v21  ;;  %v6391_v43 = vpop.f32.mrf.mxu1  ;;  %v2368_v21 = vadd.f32 %v6301_v55, %v6203_v56  ;;  %v2370_v56 = vadd.f32 %v6309_v52, %v6209_v36 }
 0x1b8   : > { %v6393_v5 = vadd.f32 %v4580_v0, %v2395_v12  ;;  %v4583_v17 = vpop.f32.mrf.mxu0 }
 0x1b9   : > { %v4533_v34 = vpop.f32.mrf.mxu1 }
 0x1ba   : > { %6981 = vst [vmem:[#allocation49_spill] sm:$0xff] %v6393_v5  ;;  %v2397_v37 = vadd.f32 %v4533_v34, %v6284_v62  ;;  %v6396_v32 = vpop.f32.mrf.mxu0  ;;  %v2637_v62 = vadd.f32 %v6293_v59, %v2369_v16  ;;  %v2371_v34 = vadd.f32 %v6305_v42, %v6206_v35 }
 0x1bb   : > { %6982 = vst [vmem:[#allocation50_spill] sm:$0xff] %v6396_v32  ;;  %v6398_v10 = vpop.f32.mrf.mxu1 }
 0x1bc   : > { %v6402_v49 = vadd.f32 %v4583_v17, %v2397_v37  ;;  %v4586_v28 = vpop.f32.mrf.mxu0  ;;  %v2636_v17 = vadd.f32 %v6299_v39, %v2368_v21  ;;  %v2639_v59 = vadd.f32 %v6303_v24, %v2371_v34  ;;  %v2638_v21 = vadd.f32 %v6307_v13, %v2370_v56 }
 0x1bd   : > { %v4536_v19 = vpop.f32.mrf.mxu1 }
 0x1be   : > { %6983 = vst [vmem:[#allocation51_spill] sm:$0xff] %v6402_v49  ;;  %v2399_v0 = vadd.f32 %v4536_v19, %v6290_v26  ;;  %v6407_v12 = vpop.f32.mrf.mxu0  ;;  %v6422_v19 = vld [vmem:[%s6739_s4] ss:$0 sm:$0xff] }
 0x1bf   : > { %6984 = vst [vmem:[#allocation52_spill] sm:$0xff] %v6407_v12  ;;  %v6409_v5 = vpop.f32.mrf.mxu1 }
 0x1c0   : > { %v6414_v32 = vadd.f32 %v4586_v28, %v2399_v0  ;;  %v4641_v3 = vpop.f32.mrf.mxu0  ;;  %v2372_v28 = vadd.f32 %v6314_v29, %v6215_v25  ;;  %v2374_v25 = vadd.f32 %v6321_v11, %v6221_v51  ;;  %v2376_v11 = vadd.f32 %v6328_v2, %v6227_v63 }
 0x1c1   : > { %v4591_v7 = vpop.f32.mrf.mxu1 }
 0x1c2   : > { %6985 = vst [vmem:[#allocation53_spill] sm:$0xff] %v6414_v32  ;;  %v2909_v55 = vadd.f32 %v4591_v7, %v2637_v62  ;;  %v3020_v26 = vpop.f32.mrf.mxu0  ;;  %v2644_v63 = vadd.f32 %v6326_v54, %v2376_v11 }
 0x1c3   : > { %v2749_v37 = vpop.f32.mrf.mxu1 }
 0x1c4   : > { %v3180_v35 = vadd.f32 %v4641_v3, %v2909_v55  ;;  %v2908_v42 = vadd.f32 %v2749_v37, %v2636_v17  ;;  %v4644_v16 = vpop.f32.mrf.mxu0  ;;  %v2640_v3 = vadd.f32 %v6312_v38, %v2372_v28 }
 0x1c5   : > { %v4594_v39 = vpop.f32.mrf.mxu1 }
 0x1c6   : > { %v3179_v36 = vadd.f32 %v3020_v26, %v2908_v42  ;;  %v2911_v52 = vadd.f32 %v4594_v39, %v2639_v59  ;;  %v3030_v0 = vpop.f32.mrf.mxu0  ;;  %v3219_v62 = vadd.f32 %v6422_v19, %v3180_v35 }
 0x1c7   : > { %v2759_v7 = vpop.f32.mrf.mxu1 }
 0x1c8   : > { %v3218_v32 = vadd.f32 %v6422_v19, %v3179_v36  ;;  %v3182_v12 = vadd.f32 %v4644_v16, %v2911_v52  ;;  %v2910_v49 = vadd.f32 %v2759_v7, %v2638_v21  ;;  %v3251_v24 = vmax.f32 %v3219_v62, 0.0  ;;  %v4647_v34 = vpop.f32.mrf.mxu0 }
 0x1c9   : > { %v4597_v17 = vpop.f32.mrf.mxu1 }
 0x1ca   : > { %v3181_v29 = vadd.f32 %v3030_v0, %v2910_v49  ;;  %v2913_v13 = vadd.f32 %v4597_v17, %v6316_v8  ;;  %3316 = vrot.lane.b32.xlu0 %v3251_v24, %s4828_s10  ;;  %v3040_v56 = vpop.f32.mrf.mxu0  ;;  %v3221_v55 = vadd.f32 %v6422_v19, %v3182_v12  ;;  %v3250_v26 = vmax.f32 %v3218_v32, 0.0 }
 0x1cb   : > { %v2769_v37 = vpop.f32.mrf.mxu1  ;;  %v2642_v8 = vadd.f32 %v6319_v48, %v2374_v25 }
 0x1cc   : > { %v3220_v59 = vadd.f32 %v6422_v19, %v3181_v29  ;;  %v2912_v35 = vadd.f32 %v2769_v37, %v2640_v3  ;;  %v3184_v42 = vadd.f32 %v4647_v34, %v2913_v13  ;;  %v3253_v38 = vmax.f32 %v3221_v55, 0.0  ;;  %v4650_v16 = vpop.f32.mrf.mxu0 }
 0x1cd   : > { %v4600_v51 = vpop.f32.mrf.mxu1 }
 0x1ce   : > { %v2915_v49 = vadd.f32 %v4600_v51, %v6323_v47  ;;  %v3183_v28 = vadd.f32 %v3040_v56, %v2912_v35  ;;  %3314 = vrot.lane.b32.xlu0 %v3250_v26, %s4828_s10  ;;  %3320 = vrot.lane.b32.xlu1 %v3253_v38, %s4828_s10  ;;  %v3050_v32 = vpop.f32.mrf.mxu0  ;;  %v3252_v12 = vmax.f32 %v3220_v59, 0.0  ;;  %v3223_v21 = vadd.f32 %v6422_v19, %v3184_v42 }
 0x1cf   : > { %v2779_v39 = vpop.f32.mrf.mxu1  ;;  %v2378_v47 = vadd.f32 %v6335_v53, %v6233_v50  ;;  %v2380_v53 = vadd.f32 %v6342_v14, %v6239_v58 }
 0x1d0   : > { %v3222_v36 = vadd.f32 %v6422_v19, %v3183_v28  ;;  %v2914_v52 = vadd.f32 %v2779_v39, %v2642_v8  ;;  %v3186_v0 = vadd.f32 %v4650_v16, %v2915_v49  ;;  %v4653_v2 = vpop.f32.mrf.mxu0  ;;  %v3255_v25 = vmax.f32 %v3223_v21, 0.0 }
 0x1d1   : > { %v4603_v48 = vpop.f32.mrf.mxu1  ;;  %v2648_v58 = vadd.f32 %v6340_v41, %v2380_v53 }
 0x1d2   : > { %v3254_v62 = vmax.f32 %v3222_v36, 0.0  ;;  %v2917_v7 = vadd.f32 %v4603_v48, %v6330_v30  ;;  %v3185_v24 = vadd.f32 %v3050_v32, %v2914_v52  ;;  %3318 = vrot.lane.b32.xlu1 %v3252_v12, %s4828_s10  ;;  %v3060_v34 = vpop.f32.mrf.mxu0  ;;  %v3225_v3 = vadd.f32 %v6422_v19, %v3186_v0 }
 0x1d3   : > { %v2789_v17 = vpop.f32.mrf.mxu1  ;;  %v2646_v30 = vadd.f32 %v6333_v6, %v2378_v47 }
 0x1d4   : > { %v3224_v29 = vadd.f32 %v6422_v19, %v3185_v24  ;;  %v2916_v13 = vadd.f32 %v2789_v17, %v2644_v63  ;;  %v3188_v56 = vadd.f32 %v4653_v2, %v2917_v7  ;;  %3322 = vrot.lane.b32.xlu0 %v3254_v62, %s4828_s10  ;;  %v4656_v54 = vpop.f32.mrf.mxu0  ;;  %v3257_v35 = vmax.f32 %v3225_v3, 0.0 }
 0x1d5   : > { %v4606_v50 = vpop.f32.mrf.mxu1 }
 0x1d6   : > { %v3256_v55 = vmax.f32 %v3224_v29, 0.0  ;;  %v2919_v26 = vadd.f32 %v4606_v50, %v6337_v45  ;;  %v3187_v37 = vadd.f32 %v3060_v34, %v2916_v13  ;;  %3324 = vrot.lane.b32.xlu1 %v3255_v25, %s4828_s10  ;;  %v3070_v59 = vpop.f32.mrf.mxu0  ;;  %v3227_v38 = vadd.f32 %v6422_v19, %v3188_v56 }
 0x1d7   : > { %v2799_v42 = vpop.f32.mrf.mxu1  ;;  %v2382_v45 = vadd.f32 %v6349_v46, %v6245_v18  ;;  %v2384_v46 = vadd.f32 %v6356_v23, %v6251_v57 }
 0x1d8   : > { %v3226_v16 = vadd.f32 %v6422_v19, %v3187_v37  ;;  %v2918_v11 = vadd.f32 %v2799_v42, %v2646_v30  ;;  %v3190_v51 = vadd.f32 %v4656_v54, %v2919_v26  ;;  %3326 = vrot.lane.b32.xlu0 %v3256_v55, %s4828_s10  ;;  %v4659_v14 = vpop.f32.mrf.mxu0  ;;  %v3259_v21 = vmax.f32 %v3227_v38, 0.0 }
 0x1d9   : > { %v4609_v6 = vpop.f32.mrf.mxu1  ;;  %v2652_v57 = vadd.f32 %v6354_v44, %v2384_v46 }
 0x1da   : > { %v3258_v8 = vmax.f32 %v3226_v16, 0.0  ;;  %v2921_v49 = vadd.f32 %v4609_v6, %v6344_v31  ;;  %v3189_v28 = vadd.f32 %v3070_v59, %v2918_v11  ;;  %3328 = vrot.lane.b32.xlu1 %v3257_v35, %s4828_s10  ;;  %v3080_v32 = vpop.f32.mrf.mxu0  ;;  %v3229_v12 = vadd.f32 %v6422_v19, %v3190_v51  ;;  %v6986_v59 = vld [vmem:[#allocation39_spill] sm:$0xff] }
 0x1db   : > { %v2809_v39 = vpop.f32.mrf.mxu1  ;;  %v2650_v31 = vadd.f32 %v6347_v40, %v2382_v45 }
 0x1dc   : > { %v3228_v36 = vadd.f32 %v6422_v19, %v3189_v28  ;;  %v2920_v52 = vadd.f32 %v2809_v39, %v2648_v58  ;;  %v3192_v0 = vadd.f32 %v4659_v14, %v2921_v49  ;;  %3330 = vrot.lane.b32.xlu0 %v3258_v8, %s4828_s10  ;;  %v4662_v41 = vpop.f32.mrf.mxu0  ;;  %v3261_v62 = vmax.f32 %v3229_v12, 0.0  ;;  %v6988_v8 = vld [vmem:[#allocation47_spill] sm:$0xff] }
 0x1dd   : > { %v4612_v18 = vpop.f32.mrf.mxu1  ;;  %v2390_v49 = vadd.f32 %v6377_v60, %v6988_v8 }
 0x1de   : > { %v3260_v2 = vmax.f32 %v3228_v36, 0.0  ;;  %v2923_v63 = vadd.f32 %v4612_v18, %v6351_v9  ;;  %v3191_v48 = vadd.f32 %v3080_v32, %v2920_v52  ;;  %3332 = vrot.lane.b32.xlu1 %v3259_v21, %s4828_s10  ;;  %v3090_v47 = vpop.f32.mrf.mxu0  ;;  %v3231_v24 = vadd.f32 %v6422_v19, %v3192_v0  ;;  %v6989_v32 = vld [vmem:[#allocation43_spill] sm:$0xff] }
 0x1df   : > { %v2819_v7 = vpop.f32.mrf.mxu1  ;;  %v2386_v9 = vadd.f32 %v6363_v61, %v6257_v20  ;;  %v2388_v20 = vadd.f32 %v6370_v4, %v6263_v27  ;;  %v6987_v4 = vld [vmem:[#allocation40_spill] sm:$0xff] }
 0x1e0   : > { %v3230_v34 = vadd.f32 %v6422_v19, %v3191_v48  ;;  %v2922_v3 = vadd.f32 %v2819_v7, %v2650_v31  ;;  %v3194_v17 = vadd.f32 %v4662_v41, %v2923_v63  ;;  %3334 = vrot.lane.b32.xlu0 %v3260_v2, %s4828_s10  ;;  %v4665_v23 = vpop.f32.mrf.mxu0  ;;  %v3263_v50 = vmax.f32 %v3231_v24, 0.0  ;;  %v6990_v2 = vld [vmem:[#allocation37_spill] sm:$0xff]  ;;  %v6991_v48 = vld [vmem:[#allocation42_spill] sm:$0xff]  ;;  %v6992_v7 = vld [vmem:[#allocation44_spill] sm:$0xff] }
 0x1e1   : > { %v4615_v40 = vpop.f32.mrf.mxu1  ;;  %v2392_v60 = vadd.f32 %v6384_v1, %v6990_v2 }
 0x1e2   : > { %v3262_v25 = vmax.f32 %v3230_v34, 0.0  ;;  %v2925_v29 = vadd.f32 %v4615_v40, %v6358_v22  ;;  %v3193_v13 = vadd.f32 %v3090_v47, %v2922_v3  ;;  %3336 = vrot.lane.b32.xlu1 %v3261_v62, %s4828_s10  ;;  %v3100_v56 = vpop.f32.mrf.mxu0  ;;  %v3233_v54 = vadd.f32 %v6422_v19, %v3194_v17 }
 0x1e3   : > { %v2829_v53 = vpop.f32.mrf.mxu1  ;;  %v2654_v22 = vadd.f32 %v6361_v15, %v2386_v9  ;;  %v2656_v15 = vadd.f32 %v6987_v4, %v2388_v20  ;;  %v2658_v47 = vadd.f32 %v6991_v48, %v2390_v49 }
 0x1e4   : > { %v3232_v30 = vadd.f32 %v6422_v19, %v3193_v13  ;;  %v2924_v55 = vadd.f32 %v2829_v53, %v2652_v57  ;;  %v3196_v26 = vadd.f32 %v4665_v23, %v2925_v29  ;;  %3338 = vrot.lane.b32.xlu0 %v3262_v25, %s4828_s10  ;;  %v4668_v44 = vpop.f32.mrf.mxu0  ;;  %v3265_v16 = vmax.f32 %v3233_v54, 0.0  ;;  %v6993_v29 = vld [vmem:[#allocation45_spill] sm:$0xff]  ;;  %v6994_v54 = vld [vmem:[#allocation38_spill] sm:$0xff] }
 0x1e5   : > { %v4618_v61 = vpop.f32.mrf.mxu1  ;;  %v2660_v13 = vadd.f32 %v6993_v29, %v2392_v60  ;;  %v2394_v53 = vadd.f32 %v6391_v43, %v6994_v54 }
 0x1e6   : > { %v3264_v37 = vmax.f32 %v3232_v30, 0.0  ;;  %v2927_v35 = vadd.f32 %v4618_v61, %v6986_v59  ;;  %v3195_v42 = vadd.f32 %v3100_v56, %v2924_v55  ;;  %3340 = vrot.lane.b32.xlu1 %v3263_v50, %s4828_s10  ;;  %v3110_v38 = vpop.f32.mrf.mxu0  ;;  %v3235_v51 = vadd.f32 %v6422_v19, %v3196_v26 }
 0x1e7   : > { %v2839_v11 = vpop.f32.mrf.mxu1 }
 0x1e8   : > { %v3234_v14 = vadd.f32 %v6422_v19, %v3195_v42  ;;  %v2926_v58 = vadd.f32 %v2839_v11, %v2654_v22  ;;  %v3198_v6 = vadd.f32 %v4668_v44, %v2927_v35  ;;  %3342 = vrot.lane.b32.xlu0 %v3264_v37, %s4828_s10  ;;  %v4671_v27 = vpop.f32.mrf.mxu0  ;;  %v3267_v0 = vmax.f32 %v3235_v51, 0.0  ;;  %v6995_v42 = vld [vmem:[#allocation21_spill] sm:$0xff] }
 0x1e9   : > { %v4621_v45 = vpop.f32.mrf.mxu1  ;;  %v2396_v43 = vadd.f32 %v6398_v10, %v6995_v42  ;;  %v6997_v51 = vld [vmem:[#allocation49_spill] sm:$0xff] }
 0x1ea   : > { %v3266_v28 = vmax.f32 %v3234_v14, 0.0  ;;  %v2929_v12 = vadd.f32 %v4621_v45, %v6989_v32  ;;  %v3197_v39 = vadd.f32 %v3110_v38, %v2926_v58  ;;  %3344 = vrot.lane.b32.xlu1 %v3265_v16, %s4828_s10  ;;  %v3120_v21 = vpop.f32.mrf.mxu0  ;;  %v3237_v36 = vadd.f32 %v6422_v19, %v3198_v6 }
 0x1eb   : > { %v2849_v52 = vpop.f32.mrf.mxu1 }
 0x1ec   : > { %v3236_v41 = vadd.f32 %v6422_v19, %v3197_v39  ;;  %v2928_v46 = vadd.f32 %v2849_v52, %v2656_v15  ;;  %v3200_v18 = vadd.f32 %v4671_v27, %v2929_v12  ;;  %3346 = vrot.lane.b32.xlu0 %v3266_v28, %s4828_s10  ;;  %v4674_v31 = vpop.f32.mrf.mxu0  ;;  %v3269_v17 = vmax.f32 %v3237_v36, 0.0  ;;  %v6998_v28 = vld [vmem:[#allocation50_spill] sm:$0xff]  ;;  %v6999_v39 = vld [vmem:[#allocation41_spill] sm:$0xff]  ;;  %v7000_v52 = vld [vmem:[#allocation51_spill] sm:$0xff] }
 0x1ed   : > { %v4624_v63 = vpop.f32.mrf.mxu1  ;;  %v2664_v32 = vadd.f32 %v6998_v28, %v2396_v43  ;;  %v7006_v43 = vld [vmem:[#allocation11_spill] sm:$0xff] }
 0x1ee   : > { %v3268_v62 = vmax.f32 %v3236_v41, 0.0  ;;  %v2931_v24 = vadd.f32 %v4624_v63, %v6992_v7  ;;  %v3199_v34 = vadd.f32 %v3120_v21, %v2928_v46  ;;  %3348 = vrot.lane.b32.xlu1 %v3267_v0, %s4828_s10  ;;  %v3130_v3 = vpop.f32.mrf.mxu0  ;;  %v3239_v57 = vadd.f32 %v6422_v19, %v3200_v18 }
 0x1ef   : > { %v2859_v23 = vpop.f32.mrf.mxu1  ;;  %v2398_v21 = vadd.f32 %v6409_v5, %v6999_v39  ;;  %v7001_v5 = vld [vmem:[#allocation52_spill] sm:$0xff] }
 0x1f0   : > { %v3238_v40 = vadd.f32 %v6422_v19, %v3199_v34  ;;  %v2930_v9 = vadd.f32 %v2859_v23, %v2658_v47  ;;  %v3202_v25 = vadd.f32 %v4674_v31, %v2931_v24  ;;  %3350 = vrot.lane.b32.xlu0 %v3268_v62, %s4828_s10  ;;  %v4677_v1 = vpop.f32.mrf.mxu0  ;;  %v3271_v61 = vmax.f32 %v3239_v57, 0.0  ;;  %v7002_v34 = vld [vmem:[#allocation53_spill] sm:$0xff] }
 0x1f1   : > { %v4627_v56 = vpop.f32.mrf.mxu1  ;;  %v2666_v7 = vadd.f32 %v7001_v5, %v2398_v21 }
 0x1f2   : > { %v3270_v50 = vmax.f32 %v3238_v40, 0.0  ;;  %v2933_v30 = vadd.f32 %v4627_v56, %v6386_v33  ;;  %v3201_v55 = vadd.f32 %v3130_v3, %v2930_v9  ;;  %3352 = vrot.lane.b32.xlu1 %v3269_v17, %s4828_s10  ;;  %v3140_v26 = vpop.f32.mrf.mxu0  ;;  %v3241_v44 = vadd.f32 %v6422_v19, %v3202_v25  ;;  %v6996_v33 = vld [vmem:[#allocation46_spill] sm:$0xff] }
 0x1f3   : > { %v2869_v20 = vpop.f32.mrf.mxu1  ;;  %v2662_v16 = vadd.f32 %v6996_v33, %v2394_v53 }
 0x1f4   : > { %v3240_v22 = vadd.f32 %v6422_v19, %v3201_v55  ;;  %v2932_v37 = vadd.f32 %v2869_v20, %v2660_v13  ;;  %v3204_v59 = vadd.f32 %v4677_v1, %v2933_v30  ;;  %3354 = vrot.lane.b32.xlu0 %v3270_v50, %s4828_s10  ;;  %v4680_v35 = vpop.f32.mrf.mxu0  ;;  %v3273_v27 = vmax.f32 %v3241_v44, 0.0  ;;  %v7003_v44 = vld [vmem:[#allocation9_spill] sm:$0xff] }
 0x1f5   : > { %v4630_v38 = vpop.f32.mrf.mxu1 }
 0x1f6   : > { %v3272_v11 = vmax.f32 %v3240_v22, 0.0  ;;  %v2935_v14 = vadd.f32 %v4630_v38, %v6997_v51  ;;  %v3203_v58 = vadd.f32 %v3140_v26, %v2932_v37  ;;  %3356 = vrot.lane.b32.xlu1 %v3271_v61, %s4828_s10  ;;  %v3150_v6 = vpop.f32.mrf.mxu0  ;;  %v3243_v15 = vadd.f32 %v6422_v19, %v3204_v59  ;;  %v7004_v22 = vld [vmem:[#allocation7_spill] sm:$0xff]  ;;  %v7005_v59 = vld [vmem:[#allocation13_spill] sm:$0xff] }
 0x1f7   : > { %v2879_v4 = vpop.f32.mrf.mxu1 }
 0x1f8   : > { %v3242_v45 = vadd.f32 %v6422_v19, %v3203_v58  ;;  %v2934_v8 = vadd.f32 %v2879_v4, %v2662_v16  ;;  %v3206_v49 = vadd.f32 %v4680_v35, %v2935_v14  ;;  %3358 = vrot.lane.b32.xlu0 %v3272_v11, %s4828_s10  ;;  %v4683_v10 = vpop.f32.mrf.mxu0  ;;  %v3275_v2 = vmax.f32 %v3243_v15, 0.0  ;;  %v7007_v16 = vld [vmem:[#allocation15_spill] sm:$0xff]  ;;  %v7008_v14 = vld [vmem:[#allocation17_spill] sm:$0xff] }
 0x1f9   : > { %v4633_v12 = vpop.f32.mrf.mxu1 }
 0x1fa   : > { %v3274_v36 = vmax.f32 %v3242_v45, 0.0  ;;  %v2937_v0 = vadd.f32 %v4633_v12, %v7000_v52  ;;  %v3205_v41 = vadd.f32 %v3150_v6, %v2934_v8  ;;  %3360 = vrot.lane.b32.xlu1 %v3273_v27, %s4828_s10  ;;  %v3160_v46 = vpop.f32.mrf.mxu0  ;;  %v3245_v18 = vadd.f32 %v6422_v19, %v3206_v49  ;;  %v7009_v27 = vld [vmem:[#allocation19_spill] sm:$0xff]  ;;  %v7010_v45 = vld [vmem:[#allocation22_spill] sm:$0xff] }
 0x1fb   : > { %v2889_v31 = vpop.f32.mrf.mxu1  ;;  %v7012_v12 = vld [vmem:[#allocation27_spill] sm:$0xff] }
 0x1fc   : > { %v3244_v60 = vadd.f32 %v6422_v19, %v3205_v41  ;;  %v2936_v63 = vadd.f32 %v2889_v31, %v2664_v32  ;;  %v3208_v48 = vadd.f32 %v4683_v10, %v2937_v0  ;;  %3362 = vrot.lane.b32.xlu0 %v3274_v36, %s4828_s10  ;;  %v4686_v47 = vpop.f32.mrf.mxu0  ;;  %v3277_v23 = vmax.f32 %v3245_v18, 0.0  ;;  %v7011_v10 = vld [vmem:[#allocation24_spill] sm:$0xff]  ;;  %v7013_v36 = vld [vmem:[#allocation29_spill] sm:$0xff]  ;;  %v7014_v41 = vld [vmem:[#allocation31_spill] sm:$0xff] }
 0x1fd   : > { %v4636_v62 = vpop.f32.mrf.mxu1  ;;  %v7015_v31 = vld [vmem:[#allocation33_spill] sm:$0xff] }
 0x1fe   : > { %v3276_v24 = vmax.f32 %v3244_v60, 0.0  ;;  %v2939_v3 = vadd.f32 %v4636_v62, %v7002_v34  ;;  %v3207_v17 = vadd.f32 %v3160_v46, %v2936_v63  ;;  %3364 = vrot.lane.b32.xlu1 %v3275_v2, %s4828_s10  ;;  %v3170_v40 = vpop.f32.mrf.mxu0  ;;  %v3247_v9 = vadd.f32 %v6422_v19, %v3208_v48  ;;  %v7016_v63 = vld [vmem:[#allocation35_spill] sm:$0xff]  ;;  %v7017_v62 = vld [vmem:[#allocation5_spill] sm:$0xff] }
 0x1ff   : > { %v2899_v57 = vpop.f32.mrf.mxu1 }
 0x200   : > { %v3246_v25 = vadd.f32 %v6422_v19, %v3207_v17  ;;  %v2938_v1 = vadd.f32 %v2899_v57, %v2666_v7  ;;  %v3210_v29 = vadd.f32 %v4686_v47, %v2939_v3  ;;  %3366 = vrot.lane.b32.xlu0 %v3276_v24, %s4828_s10  ;;  %v3279_v53 = vmax.f32 %v3247_v9, 0.0  ;;  %v7018_v24 = vld [vmem:[#allocation6_spill] sm:$0xff]  ;;  %v7019_v17 = vld [vmem:[#allocation8_spill] sm:$0xff] }
 0x202   : > { %v3278_v13 = vmax.f32 %v3246_v25, 0.0  ;;  %v3249_v56 = vadd.f32 %v6422_v19, %v3210_v29  ;;  %v3209_v54 = vadd.f32 %v3170_v40, %v2938_v1  ;;  %3368 = vrot.lane.b32.xlu1 %v3277_v23, %s4828_s10  ;;  %v7020_v40 = vld [vmem:[#allocation10_spill] sm:$0xff]  ;;  %v7021_v1 = vld [vmem:[#allocation12_spill] sm:$0xff] }
 0x204   : > { %v3248_v50 = vadd.f32 %v6422_v19, %v3209_v54  ;;  %3370 = vrot.lane.b32.xlu0 %v3278_v13, %s4828_s10  ;;  %v3281_v55 = vmax.f32 %v3249_v56, 0.0  ;;  %v7022_v56 = vld [vmem:[#allocation14_spill] sm:$0xff] }
 0x206   : > { %v3280_v30 = vmax.f32 %v3248_v50, 0.0  ;;  %3372 = vrot.lane.b32.xlu1 %v3279_v53, %s4828_s10  ;;  %v7023_v50 = vld [vmem:[#allocation16_spill] sm:$0xff] }
 0x208   : > { %3374 = vrot.lane.b32.xlu0 %v3280_v30, %s4828_s10 }
 0x20a   : > { %3376 = vrot.lane.b32.xlu1 %v3281_v55, %s4828_s10 }
 0x23c   : > { %v3317_v26 = vpop.permute.xlu0 %3316 }
 0x23d   : > { %v3411_v20 = vsel %vm564_vm2, %v7003_v44, %v3317_v26  ;;  %v7024_v26 = vld [vmem:[#allocation18_spill] sm:$0xff] }
 0x23e   : > { %3444 = vst.msk [vmem:[%s6551_s13 + $0x8] sm:$0xff] %vm3442_vm4, %v3411_v20 }
 0x240   : > { %v3315_v19 = vpop.permute.xlu0 %3314  ;;  %v3321_v61 = vpop.permute.xlu1 %3320 }
 0x241   : > { %v3410_v37 = vsel %vm564_vm2, %v7004_v22, %v3315_v19  ;;  %v3413_v35 = vsel %vm564_vm2, %v7005_v59, %v3321_v61  ;;  %v7025_v19 = vld [vmem:[#allocation20_spill] sm:$0xff] }
 0x242   : > { %3443 = vst.msk [vmem:[%s6551_s13] sm:$0xff] %vm3442_vm4, %v3410_v37  ;;  %3446 = vst.msk [vmem:[%s6551_s13 + $0x18] sm:$0xff] %vm3442_vm4, %v3413_v35  ;;  %v7026_v37 = vld [vmem:[#allocation23_spill] sm:$0xff] }
 0x244   : > { %v3319_v42 = vpop.permute.xlu1 %3318 }
 0x245   : > { %v3412_v38 = vsel %vm564_vm2, %v7006_v43, %v3319_v42  ;;  %v7027_v42 = vld [vmem:[#allocation25_spill] sm:$0xff] }
 0x246   : > { %3445 = vst.msk [vmem:[%s6551_s13 + $0x10] sm:$0xff] %vm3442_vm4, %v3412_v38  ;;  %v3323_v33 = vpop.permute.xlu0 %3322 }
 0x247   : > { %v3414_v11 = vsel %vm564_vm2, %v7007_v16, %v3323_v33  ;;  %v7028_v33 = vld [vmem:[#allocation28_spill] sm:$0xff] }
 0x248   : > { %3447 = vst.msk [vmem:[%s6551_s13 + $0x20] sm:$0xff] %vm3442_vm4, %v3414_v11  ;;  %v3325_v51 = vpop.permute.xlu1 %3324 }
 0x249   : > { %v3415_v58 = vsel %vm564_vm2, %v7008_v14, %v3325_v51  ;;  %v7029_v51 = vld [vmem:[#allocation30_spill] sm:$0xff] }
 0x24a   : > { %3448 = vst.msk [vmem:[%s6551_s13 + $0x28] sm:$0xff] %vm3442_vm4, %v3415_v58  ;;  %v3327_v6 = vpop.permute.xlu0 %3326 }
 0x24b   : > { %v3416_v4 = vsel %vm564_vm2, %v7009_v27, %v3327_v6  ;;  %v7030_v6 = vld [vmem:[#allocation32_spill] sm:$0xff] }
 0x24c   : > { %3449 = vst.msk [vmem:[%s6551_s13 + $0x30] sm:$0xff] %vm3442_vm4, %v3416_v4  ;;  %v3329_v15 = vpop.permute.xlu1 %3328 }
 0x24d   : > { %v3417_v8 = vsel %vm564_vm2, %v7010_v45, %v3329_v15  ;;  %v7031_v15 = vld [vmem:[#allocation34_spill] sm:$0xff] }
 0x24e   : > { %3450 = vst.msk [vmem:[%s6551_s13 + $0x38] sm:$0xff] %vm3442_vm4, %v3417_v8  ;;  %v3331_v49 = vpop.permute.xlu0 %3330 }
 0x24f   : > { %v3418_v28 = vsel %vm564_vm2, %v7011_v10, %v3331_v49  ;;  %v7032_v49 = vld [vmem:[#allocation36_spill] sm:$0xff] }
 0x250   : > { %3451 = vst.msk [vmem:[%s6551_s13 + $0x40] sm:$0xff] %vm3442_vm4, %v3418_v28  ;;  %v3333_v32 = vpop.permute.xlu1 %3332 }
 0x251   : > { %v3419_v39 = vsel %vm564_vm2, %v7012_v12, %v3333_v32  ;;  %v7033_v32 = vld [vmem:[#allocation26_spill] sm:$0xff] }
 0x252   : > { %3452 = vst.msk [vmem:[%s6551_s13 + $0x48] sm:$0xff] %vm3442_vm4, %v3419_v39  ;;  %v3335_v21 = vpop.permute.xlu0 %3334 }
 0x253   : > { %v3420_v52 = vsel %vm564_vm2, %v7013_v36, %v3335_v21  ;;  %v7034_v21 = vld [vmem:[#allocation48_spill] sm:$0xff] }
 0x254   : > { %3453 = vst.msk [vmem:[%s6551_s13 + $0x50] sm:$0xff] %vm3442_vm4, %v3420_v52  ;;  %v3337_v0 = vpop.permute.xlu1 %3336 }
 0x255   : > { %v3421_v46 = vsel %vm564_vm2, %v7014_v41, %v3337_v0 }
 0x256   : > { %3454 = vst.msk [vmem:[%s6551_s13 + $0x58] sm:$0xff] %vm3442_vm4, %v3421_v46  ;;  %v3339_v18 = vpop.permute.xlu0 %3338 }
 0x257   : > { %v3422_v2 = vsel %vm564_vm2, %v7015_v31, %v3339_v18 }
 0x258   : > { %3455 = vst.msk [vmem:[%s6551_s13 + $0x60] sm:$0xff] %vm3442_vm4, %v3422_v2  ;;  %v3341_v60 = vpop.permute.xlu1 %3340 }
 0x259   : > { %v3423_v48 = vsel %vm564_vm2, %v7016_v63, %v3341_v60 }
 0x25a   : > { %3456 = vst.msk [vmem:[%s6551_s13 + $0x68] sm:$0xff] %vm3442_vm4, %v3423_v48  ;;  %v3343_v47 = vpop.permute.xlu0 %3342 }
 0x25b   : > { %v3424_v5 = vsel %vm564_vm2, %v7017_v62, %v3343_v47 }
 0x25c   : > { %3457 = vst.msk [vmem:[%s6551_s13 + $0x70] sm:$0xff] %vm3442_vm4, %v3424_v5  ;;  %v3345_v7 = vpop.permute.xlu1 %3344 }
 0x25d   : > { %v3425_v34 = vsel %vm564_vm2, %v7018_v24, %v3345_v7 }
 0x25e   : > { %3458 = vst.msk [vmem:[%s6551_s13 + $0x78] sm:$0xff] %vm3442_vm4, %v3425_v34  ;;  %v3347_v3 = vpop.permute.xlu0 %3346 }
 0x25f   : > { %v3426_v23 = vsel %vm564_vm2, %v7019_v17, %v3347_v3 }
 0x260   : > { %3459 = vst.msk [vmem:[%s6551_s13 + $0x80] sm:$0xff] %vm3442_vm4, %v3426_v23  ;;  %v3349_v57 = vpop.permute.xlu1 %3348 }
 0x261   : > { %v3427_v9 = vsel %vm564_vm2, %v7020_v40, %v3349_v57 }
 0x262   : > { %3460 = vst.msk [vmem:[%s6551_s13 + $0x88] sm:$0xff] %vm3442_vm4, %v3427_v9  ;;  %v3351_v25 = vpop.permute.xlu0 %3350 }
 0x263   : > { %v3428_v29 = vsel %vm564_vm2, %v7021_v1, %v3351_v25 }
 0x264   : > { %3461 = vst.msk [vmem:[%s6551_s13 + $0x90] sm:$0xff] %vm3442_vm4, %v3428_v29  ;;  %v3353_v13 = vpop.permute.xlu1 %3352 }
 0x265   : > { %v3429_v54 = vsel %vm564_vm2, %v7022_v56, %v3353_v13 }
 0x266   : > { %3462 = vst.msk [vmem:[%s6551_s13 + $0x98] sm:$0xff] %vm3442_vm4, %v3429_v54  ;;  %v3355_v53 = vpop.permute.xlu0 %3354 }
 0x267   : > { %v3430_v30 = vsel %vm564_vm2, %v7023_v50, %v3355_v53 }
 0x268   : > { %3463 = vst.msk [vmem:[%s6551_s13 + $0xa0] sm:$0xff] %vm3442_vm4, %v3430_v30  ;;  %v3357_v55 = vpop.permute.xlu1 %3356 }
 0x269   : > { %v3431_v44 = vsel %vm564_vm2, %v7024_v26, %v3357_v55 }
 0x26a   : > { %3464 = vst.msk [vmem:[%s6551_s13 + $0xa8] sm:$0xff] %vm3442_vm4, %v3431_v44  ;;  %v3359_v20 = vpop.permute.xlu0 %3358 }
 0x26b   : > { %v3432_v61 = vsel %vm564_vm2, %v7025_v19, %v3359_v20 }
 0x26c   : > { %3465 = vst.msk [vmem:[%s6551_s13 + $0xb0] sm:$0xff] %vm3442_vm4, %v3432_v61  ;;  %v3361_v22 = vpop.permute.xlu1 %3360 }
 0x26d   : > { %v3433_v59 = vsel %vm564_vm2, %v7026_v37, %v3361_v22 }
 0x26e   : > { %3466 = vst.msk [vmem:[%s6551_s13 + $0xb8] sm:$0xff] %vm3442_vm4, %v3433_v59  ;;  %v3363_v35 = vpop.permute.xlu0 %3362 }
 0x26f   : > { %v3434_v43 = vsel %vm564_vm2, %v7027_v42, %v3363_v35 }
 0x270   : > { %3467 = vst.msk [vmem:[%s6551_s13 + $0xc0] sm:$0xff] %vm3442_vm4, %v3434_v43  ;;  %v3365_v38 = vpop.permute.xlu1 %3364 }
 0x271   : > { %v3435_v16 = vsel %vm564_vm2, %v7028_v33, %v3365_v38 }
 0x272   : > { %3468 = vst.msk [vmem:[%s6551_s13 + $0xc8] sm:$0xff] %vm3442_vm4, %v3435_v16  ;;  %v3367_v11 = vpop.permute.xlu0 %3366 }
 0x273   : > { %v3436_v14 = vsel %vm564_vm2, %v7029_v51, %v3367_v11 }
 0x274   : > { %3469 = vst.msk [vmem:[%s6551_s13 + $0xd0] sm:$0xff] %vm3442_vm4, %v3436_v14  ;;  %v3369_v58 = vpop.permute.xlu1 %3368 }
 0x275   : > { %v3437_v27 = vsel %vm564_vm2, %v7030_v6, %v3369_v58 }
 0x276   : > { %3470 = vst.msk [vmem:[%s6551_s13 + $0xd8] sm:$0xff] %vm3442_vm4, %v3437_v27  ;;  %v3371_v4 = vpop.permute.xlu0 %3370 }
 0x277   : > { %v3438_v45 = vsel %vm564_vm2, %v7031_v15, %v3371_v4 }
 0x278   : > { %3471 = vst.msk [vmem:[%s6551_s13 + $0xe0] sm:$0xff] %vm3442_vm4, %v3438_v45  ;;  %v3373_v8 = vpop.permute.xlu1 %3372 }
 0x279   : > { %v3439_v10 = vsel %vm564_vm2, %v7032_v49, %v3373_v8 }
 0x27a   : > { %3472 = vst.msk [vmem:[%s6551_s13 + $0xe8] sm:$0xff] %vm3442_vm4, %v3439_v10  ;;  %v3375_v28 = vpop.permute.xlu0 %3374 }
 0x27b   : > { %v3440_v12 = vsel %vm564_vm2, %v7033_v32, %v3375_v28 }
 0x27c   : > { %3473 = vst.msk [vmem:[%s6551_s13 + $0xf0] sm:$0xff] %vm3442_vm4, %v3440_v12  ;;  %v3377_v39 = vpop.permute.xlu1 %3376 }
 0x27d   : > { %v3441_v36 = vsel %vm564_vm2, %v7034_v21, %v3377_v39 }
 0x27e   : > { %3474 = vst.msk [vmem:[%s6551_s13 + $0xf8] sm:$0xff] %vm3442_vm4, %v3441_v36 }
 0x27f   : > { %4763 = shalt.err (!%p4760_p5)
}
 0x280   : > { %s4764_s8 = scalar_lea.hbm %s6678_s25, 4096  ;;  %s4768_s11 = scalar_lea.hbm %s6740_s5, 8192 }
 0x281   : > { %p4765_p6 = scmp.ne.s32.totalorder %s6678_s25, %s4764_s8  ;;  %p4769_p10 = scmp.lt.s32.totalorder %s6678_s25, %s6740_s5 }
 0x282   : > { %p4770_p11 = scmp.lt.s32.totalorder %s4768_s11, %s4764_s8 }
 0x283   : > { %p4766_p7 = pnand %p4765_p6, %p4902_p4 }
 0x284   : > { %p4771_p12 = por %p4770_p11, %p4769_p10 }
 0x285   : > { %p4767_p9 = pneg %p4766_p7 }
 0x287   : > { %p4772_p13 = pnand %p4771_p12, %p4767_p9 }
 0x289   : > { %4775 = shalt.err (!%p4772_p13)
}
 0x28a   : > { %s4830_s15 = smov 128   ;;  %s4831_s17 = smov 8  }
 0x28b   : > { %4691 = dma.vmem_to_hbm [thread:$0]  (%p4902_p4), %s6680_s16, 4096, %s6678_s25, %s6690_s21, %s4830_s15, %s4830_s15, %s4831_s17  }
 0x28c PF: > { %p4698_p0 = scmp.ge.s32.totalorder %s4826_s23, 2  ;;  %s3506_s24 = sand.u32 1, %s4806_s18  }
 0x28d   : > { %s3507_s27 = scalar_lea.sflag [#allocation3], %s3506_s24 }
 0x28e   : > { %p4694_p1 = pnand %p4698_p0, %p4909_p8 }
 0x290   : > { %p4695_p2 = pneg %p4694_p1 }
 0x292   : > { %4801 = dma.done.wait (%p4695_p2), %s3507_s27, 4096  }
 0x293   : > { %4803 = vsyncadd (%p4695_p2), %s3507_s27, 4294963200  ;;  %s18_s23 = sadd.s32 1, %s4826_s23   ;;  %s7035_s18 = smov %s4810_s19 }
 0x294   : > { %p15_p3 = scmp.ge.s32.totalorder %s18_s23, 4   ;;  %s7036_s19 = smov %s4814_s20 }
 0x295   : > { %s7037_s20 = smov %s4915_s6  ;;  %s7038_s21 = smov %s4822_s22 }
 0x296   : > { %s7039_s22 = smov %s7041_s26  ;;  %17 = sbr.rel (!%p15_p3) target bundleno = 4 (0x4), region = 89 }
 0x29b   :  { %3512 = vsyncpa [#allocation3], 1 }
 0x29c   :  { %3514 = vsyncpa [#allocation3 + $0x1], 1 }

</bundles_post_ra>
